<compile_context>
chip_gen: v7x
topology: tpu7x:2x2x1
jax: 0.10.0
libtpu: 0.0.40
codegen_flags: <defaults>
</compile_context>

<pallas_src>
import functools

import jax
import jax.numpy as jnp
from jax import lax
from jax.experimental import pallas as pl
from jax.experimental.pallas import tpu as pltpu


def _perceiver_kernel(lat_ref, inp_ref, wq_ref, wk_ref, wv_ref, w1_ref, w2_ref,
                      vecs_ref, out_ref, q_sc, m_sc, l_sc, acc_sc, *,
                      gelu_approx=False):
    Bt, L, D = lat_ref.shape
    _, Skv, Din = inp_ref.shape
    Dm = w1_ref.shape[1]

    j = pl.program_id(1)
    n_kv = pl.num_programs(1)
    scale = 1.0 / (float(D) ** 0.5)

    # ---- KV step 0: project Q once (scale folded in), init online-softmax ----
    @pl.when(j == 0)
    def _():
        lat2 = lat_ref[...].reshape(Bt * L, D).astype(jnp.bfloat16)
        q = jnp.dot(lat2, wq_ref[...], preferred_element_type=jnp.float32)
        q_sc[...] = (q * scale).astype(jnp.bfloat16)
        m_sc[...] = jnp.full_like(m_sc, -jnp.inf)
        l_sc[...] = jnp.zeros_like(l_sc)
        acc_sc[...] = jnp.zeros_like(acc_sc)

    # ---- KV projection for this tile (separate Wk/Wv: no in-tile slicing) ----
    x2 = inp_ref[...].reshape(Bt * Skv, Din)                # already bf16
    k = jnp.dot(x2, wk_ref[...], preferred_element_type=jnp.float32)
    v = jnp.dot(x2, wv_ref[...], preferred_element_type=jnp.float32)
    kb = k.reshape(Bt, Skv, D).astype(jnp.bfloat16)
    vb = v.reshape(Bt, Skv, D).astype(jnp.bfloat16)
    qb = q_sc[...].reshape(Bt, L, D)

    # ---- online softmax over the KV axis (contraction on last dims) ----
    s = jnp.einsum("bld,bsd->bls", qb, kb,
                   preferred_element_type=jnp.float32)      # (Bt, L, Skv)
    m_prev = m_sc[...]
    m_new = jnp.maximum(m_prev, jnp.max(s, axis=-1, keepdims=True))
    alpha = jnp.exp(m_prev - m_new)
    p = jnp.exp(s - m_new)
    l_sc[...] = alpha * l_sc[...] + jnp.sum(p, axis=-1, keepdims=True)
    acc_sc[...] = alpha * acc_sc[...] + jnp.einsum(
        "bls,bsd->bld", p.astype(jnp.bfloat16), vb,
        preferred_element_type=jnp.float32)
    m_sc[...] = m_new

    # ---- last KV step: normalize, FFN, residual, LayerNorm, store ----
    @pl.when(j == n_kv - 1)
    def _():
        # EUP reciprocal; systematic <1e-3 deviation vs exact divide (see review).
        inv_l = pl.reciprocal(l_sc[...], approx=True)
        f2 = (acc_sc[...] * inv_l).reshape(Bt * L, D)

        vecs = vecs_ref[...]                                # packed [b1,b2,gamma,beta]
        b1 = vecs[0:1, :Dm]
        b2 = vecs[1:2, :D]
        gamma = vecs[2:3, :D]
        beta = vecs[3:4, :D]

        h = jnp.dot(f2.astype(jnp.bfloat16), w1_ref[...],
                    preferred_element_type=jnp.float32) + b1
        if gelu_approx:
            c = 0.7978845608028654  # sqrt(2/pi)
            h = 0.5 * h * (1.0 + jnp.tanh(c * (h + 0.044715 * h * h * h)))
        else:
            # exact erf GELU == PyTorch nn.GELU() default
            h = 0.5 * h * (1.0 + lax.erf(h * 0.7071067811865475))
        y = jnp.dot(h.astype(jnp.bfloat16), w2_ref[...],
                    preferred_element_type=jnp.float32) + b2

        # residual uses the f32 latents; LayerNorm: biased var, eps=1e-5
        r = lat_ref[...].reshape(Bt * L, D) + y
        mean = jnp.mean(r, axis=-1, keepdims=True)
        var = jnp.mean((r - mean) ** 2, axis=-1, keepdims=True)
        normed = (r - mean) * lax.rsqrt(var + 1e-5)
        out_ref[...] = (normed * gamma + beta).reshape(Bt, L, D)


def prepare_params(params):
    """One-time parameter prep (hoisted out of the per-call hot path):
    bf16 weight casts, KV-weight split, small vectors packed into one tile."""
    D = params["wq"].shape[0]
    Dm = params["w1"].shape[1]
    wkv = params["wkv"]
    Dh = max(D, Dm)

    def _pad(v):
        v = v.reshape(-1).astype(jnp.float32)
        return jnp.pad(v, (0, Dh - v.shape[0]))

    return {
        "wq": params["wq"].astype(jnp.bfloat16),
        "wk": wkv[:, :D].astype(jnp.bfloat16),
        "wv": wkv[:, D:].astype(jnp.bfloat16),
        "w1": params["w1"].astype(jnp.bfloat16),
        "w2": params["w2"].astype(jnp.bfloat16),
        "vecs": jnp.stack([_pad(params["b1"]), _pad(params["b2"]),
                           _pad(params["gamma"]), _pad(params["beta"])]),
    }


def _device_kind():
    try:
        return jax.devices()[0].device_kind.lower()
    except Exception:
        return ""


def perceiver_block(latents, inp, prepped, *, block_b=None, block_s=None,
                    gelu_approx=False):
    """latents: (B, L, D) f32, inp: (B, S, Din). prepped = prepare_params(...)."""
    B, L, D = latents.shape
    _, S, Din = inp.shape
    Dm = prepped["w1"].shape[1]
    Dh = prepped["vecs"].shape[1]

    kind = _device_kind()
    is_v7 = "v7" in kind

    # Batch tile: one grid step on single-TC v5e/v6e; split across the two
    # TensorCores on v7x-class parts when the batch allows it.
    if block_b is None:
        block_b = B
        if is_v7 and B >= 2 and B % 2 == 0:
            block_b = B // 2
    assert B % block_b == 0

    # KV tile: full S at small sizes; bounded tile at realistic S.
    if block_s is None:
        block_s = S
        if S > 1024:
            for cand in (1024, 512, 256, 128):
                if S % cand == 0:
                    block_s = cand
                    break
    assert S % block_s == 0

    # `inp` only feeds the bf16 KV projection -> halve its DMA/VMEM footprint.
    inp_bf = inp.astype(jnp.bfloat16)

    # VMEM budget: activations double-buffered, weights single-buffered.
    weight_bytes = (D * D + 2 * Din * D + D * Dm + Dm * D) * 2 + 4 * Dh * 4
    est = (2 * block_b * L * D * 4            # latents block (f32) x2 buffers
           + 2 * block_b * block_s * Din * 2  # inp block (bf16) x2 buffers
           + weight_bytes
           + block_b * L * (2 * D + 8 + 4 * D)  # q/m/l/acc scratch
           + 2 * block_b * L * D * 4)         # out block x2 buffers
    vmem_cap = (48 if is_v7 else 100) * 1024 * 1024
    vmem_limit = int(min(vmem_cap, max(32 * 1024 * 1024, 2 * est)))

    cost = pl.CostEstimate(
        flops=int(2 * B * (L * D * D + S * Din * 2 * D + 2 * L * S * D
                           + 2 * L * D * Dm)),
        transcendentals=int(B * L * (S + Dm)),
        bytes_accessed=int(B * L * D * 4 + B * S * Din * 2 + weight_bytes
                           + B * L * D * 4),
    )

    args = (latents, inp_bf, prepped["wq"], prepped["wk"], prepped["wv"],
            prepped["w1"], prepped["w2"], prepped["vecs"])

    def build(single_buffer_weights):
        def wspec(shape):
            kw = {}
            if single_buffer_weights:
                # constant index_map -> block never changes; 1 buffer suffices
                kw["pipeline_mode"] = pl.Buffered(1)
            n = len(shape)
            return pl.BlockSpec(shape, lambda i, j, _n=n: (0,) * _n, **kw)

        grid_spec = pltpu.PrefetchScalarGridSpec(
            num_scalar_prefetch=0,
            grid=(B // block_b, S // block_s),
            in_specs=[
                pl.BlockSpec((block_b, L, D), lambda i, j: (i, 0, 0)),      # latents
                pl.BlockSpec((block_b, block_s, Din), lambda i, j: (i, j, 0)),  # inp
                wspec((D, D)),        # Wq
                wspec((Din, D)),      # Wk
                wspec((Din, D)),      # Wv
                wspec((D, Dm)),       # ff W1
                wspec((Dm, D)),       # ff W2
                wspec((4, Dh)),       # packed [b1, b2, gamma, beta]
            ],
            out_specs=pl.BlockSpec((block_b, L, D), lambda i, j: (i, 0, 0)),
            scratch_shapes=[
                pltpu.VMEM((block_b * L, D), jnp.bfloat16),   # cached scaled q
                pltpu.VMEM((block_b, L, 1), jnp.float32),     # m (running max)
                pltpu.VMEM((block_b, L, 1), jnp.float32),     # l (running sum)
                pltpu.VMEM((block_b, L, D), jnp.float32),     # acc
            ])

        return pl.pallas_call(
            functools.partial(_perceiver_kernel, gelu_approx=gelu_approx),
            out_shape=jax.ShapeDtypeStruct((B, L, D), jnp.float32),
            grid_spec=grid_spec,
            compiler_params=pltpu.CompilerParams(
                dimension_semantics=("parallel", "arbitrary"),
                vmem_limit_bytes=vmem_limit),
            cost_estimate=cost,
        )

    try:
        return build(True)(*args)
    except Exception:
        # Fallback for Pallas versions without BlockSpec(pipeline_mode=...).
        return build(False)(*args)


def perceiver_block_ref(latents, inp, params):
    """Pure-JAX f32 reference mirroring the PyTorch module."""
    D = latents.shape[-1]
    q = latents @ params["wq"]
    kv = inp @ params["wkv"]
    k, v = kv[..., :D], kv[..., D:]
    s = (q @ jnp.swapaxes(k, -1, -2)) / jnp.sqrt(jnp.float32(D))
    w = jax.nn.softmax(s, axis=-1)
    f = w @ v
    h = jax.nn.gelu(f @ params["w1"] + params["b1"], approximate=False)
    y = h @ params["w2"] + params["b2"]
    r = latents + y
    mean = jnp.mean(r, axis=-1, keepdims=True)
    var = jnp.mean((r - mean) ** 2, axis=-1, keepdims=True)
    return ((r - mean) * lax.rsqrt(var + 1e-5)) * params["gamma"] + params["beta"]


def make_params(key, latent_dim, inp_dim, mult=1):
    """Deterministic synthetic parameters (shapes match nn.Linear / nn.LayerNorm)."""
    ks = jax.random.split(key, 6)
    hid = int(latent_dim * mult)
    sc = 0.05
    # stored directly as (in_features, out_features) == PyTorch weight.T
    return {
        "wq": sc * jax.random.normal(ks[0], (latent_dim, latent_dim), jnp.float32),
        "wkv": sc * jax.random.normal(ks[1], (inp_dim, 2 * latent_dim), jnp.float32),
        "w1": sc * jax.random.normal(ks[2], (latent_dim, hid), jnp.float32),
        "b1": sc * jax.random.normal(ks[3], (1, hid), jnp.float32),
        "w2": sc * jax.random.normal(ks[4], (hid, latent_dim), jnp.float32),
        "b2": sc * jax.random.normal(ks[5], (1, latent_dim), jnp.float32),
        "gamma": jnp.ones((1, latent_dim), jnp.float32),   # PyTorch LN defaults
        "beta": jnp.zeros((1, latent_dim), jnp.float32),
    }


if __name__ == "__main__":
    B, L, S = 2, 8, 16
    latent_dim, inp_dim = 32, 64

    key = jax.random.PRNGKey(0)
    k_lat, k_inp, k_par = jax.random.split(key, 3)
    latents = jax.random.normal(k_lat, (B, L, latent_dim), jnp.float32)
    inp = jax.random.normal(k_inp, (B, S, inp_dim), jnp.float32)
    params = make_params(k_par, latent_dim, inp_dim)

    # One-time bf16 prep (hoisted out of the call path).
    prepped = prepare_params(params)

    out = perceiver_block(latents, inp, prepped)
    out = jax.block_until_ready(out)

    ref = perceiver_block_ref(latents, inp, params)
    assert out.shape == (B, L, latent_dim)
    # Tolerance accounts for bf16 MXU inputs + approx reciprocal (f32 reference).
    assert jnp.allclose(out, ref, atol=1e-2, rtol=1e-2), "mismatch vs reference"

    print("KERNEL_OK")
</pallas_src>

<mosaic_0001>
module attributes {stable_mosaic.version = 11 : i64} {
  func.func @_perceiver_kernel(%arg0: i32, %arg1: i32, %arg2: memref<2x8x32xf32, #tpu.memory_space<vmem>>, %arg3: memref<2x16x64xbf16, #tpu.memory_space<vmem>>, %arg4: memref<32x32xbf16, #tpu.memory_space<vmem>>, %arg5: memref<64x32xbf16, #tpu.memory_space<vmem>>, %arg6: memref<64x32xbf16, #tpu.memory_space<vmem>>, %arg7: memref<32x32xbf16, #tpu.memory_space<vmem>>, %arg8: memref<32x32xbf16, #tpu.memory_space<vmem>>, %arg9: memref<4x32xf32, #tpu.memory_space<vmem>>, %arg10: memref<2x8x32xf32, #tpu.memory_space<vmem>>, %arg11: memref<16x32xbf16, #tpu.memory_space<vmem>>, %arg12: memref<2x8x1xf32, #tpu.memory_space<vmem>>, %arg13: memref<2x8x1xf32, #tpu.memory_space<vmem>>, %arg14: memref<2x8x32xf32, #tpu.memory_space<vmem>>) attributes {dimension_semantics = [#tpu.dimension_semantics<parallel>, #tpu.dimension_semantics<arbitrary>], iteration_bounds = array<i64: 1, 1>, scalar_prefetch = 0 : i64, scratch_operands = 4 : i64, tpu.core_type = #tpu.core_type<tc>, window_params = [{transform_indices = @transform_0, window_bounds = array<i64: 2, 8, 32>}, {transform_indices = @transform_1, window_bounds = array<i64: 2, 16, 64>}, {pipeline_mode = #tpu.pipeline_mode<synchronous>, transform_indices = @transform_2, window_bounds = array<i64: 32, 32>}, {pipeline_mode = #tpu.pipeline_mode<synchronous>, transform_indices = @transform_3, window_bounds = array<i64: 64, 32>}, {pipeline_mode = #tpu.pipeline_mode<synchronous>, transform_indices = @transform_4, window_bounds = array<i64: 64, 32>}, {pipeline_mode = #tpu.pipeline_mode<synchronous>, transform_indices = @transform_5, window_bounds = array<i64: 32, 32>}, {pipeline_mode = #tpu.pipeline_mode<synchronous>, transform_indices = @transform_6, window_bounds = array<i64: 32, 32>}, {pipeline_mode = #tpu.pipeline_mode<synchronous>, transform_indices = @transform_7, window_bounds = array<i64: 4, 32>}, {transform_indices = @transform_8, window_bounds = array<i64: 2, 8, 32>}]} {
    %c0_i32 = arith.constant 0 : i32
    %0 = arith.cmpi eq, %arg1, %c0_i32 : i32
    %1 = arith.extui %0 : i1 to i32
    %c0_i32_0 = arith.constant 0 : i32
    %2 = arith.cmpi ne, %1, %c0_i32_0 : i32
    scf.if %2 {
      %c0_34 = arith.constant 0 : index
      %c0_35 = arith.constant 0 : index
      %c0_36 = arith.constant 0 : index
      %42 = vector.load %arg2[%c0_34, %c0_35, %c0_36] : memref<2x8x32xf32, #tpu.memory_space<vmem>>, vector<2x8x32xf32>
      %43 = vector.shape_cast %42 : vector<2x8x32xf32> to vector<16x32xf32>
      %44 = arith.truncf %43 : vector<16x32xf32> to vector<16x32xbf16>
      %c0_37 = arith.constant 0 : index
      %c0_38 = arith.constant 0 : index
      %45 = vector.load %arg4[%c0_37, %c0_38] : memref<32x32xbf16, #tpu.memory_space<vmem>>, vector<32x32xbf16>
      %cst_39 = arith.constant dense<0.000000e+00> : vector<16x32xf32>
      %46 = tpu.matmul %44, %45, %cst_39 {dimension_numbers = #tpu.dot_dimension_numbers<[1], [0], [0], [1], [0, 0, 1, 1], [], []>} : vector<16x32xbf16>, vector<32x32xbf16>, vector<16x32xf32> -> vector<16x32xf32>
      %cst_40 = arith.constant 0.176776692 : f32
      %47 = vector.broadcast %cst_40 : f32 to vector<16x32xf32>
      %48 = arith.mulf %46, %47 : vector<16x32xf32>
      %49 = arith.truncf %48 : vector<16x32xf32> to vector<16x32xbf16>
      %c0_41 = arith.constant 0 : index
      %c0_42 = arith.constant 0 : index
      %50 = vector.load %arg11[%c0_41, %c0_42] : memref<16x32xbf16, #tpu.memory_space<vmem>>, vector<16x32xbf16>
      tpu.vector_store %arg11[%c0_41, %c0_42], %49 {strides = array<i32>} : memref<16x32xbf16, #tpu.memory_space<vmem>>, vector<16x32xbf16>,
      %cst_43 = arith.constant 0xFF800000 : f32
      %51 = vector.broadcast %cst_43 : f32 to vector<2x8x1xf32>
      %c0_44 = arith.constant 0 : index
      %c0_45 = arith.constant 0 : index
      %c0_46 = arith.constant 0 : index
      %52 = vector.load %arg12[%c0_44, %c0_45, %c0_46] : memref<2x8x1xf32, #tpu.memory_space<vmem>>, vector<2x8x1xf32>
      tpu.vector_store %arg12[%c0_44, %c0_45, %c0_46], %51 {strides = array<i32>} : memref<2x8x1xf32, #tpu.memory_space<vmem>>, vector<2x8x1xf32>,
      %cst_47 = arith.constant 0.000000e+00 : f32
      %53 = vector.broadcast %cst_47 : f32 to vector<2x8x1xf32>
      %c0_48 = arith.constant 0 : index
      %c0_49 = arith.constant 0 : index
      %c0_50 = arith.constant 0 : index
      %54 = vector.load %arg13[%c0_48, %c0_49, %c0_50] : memref<2x8x1xf32, #tpu.memory_space<vmem>>, vector<2x8x1xf32>
      tpu.vector_store %arg13[%c0_48, %c0_49, %c0_50], %53 {strides = array<i32>} : memref<2x8x1xf32, #tpu.memory_space<vmem>>, vector<2x8x1xf32>,
      %cst_51 = arith.constant 0.000000e+00 : f32
      %55 = vector.broadcast %cst_51 : f32 to vector<2x8x32xf32>
      %c0_52 = arith.constant 0 : index
      %c0_53 = arith.constant 0 : index
      %c0_54 = arith.constant 0 : index
      %56 = vector.load %arg14[%c0_52, %c0_53, %c0_54] : memref<2x8x32xf32, #tpu.memory_space<vmem>>, vector<2x8x32xf32>
      tpu.vector_store %arg14[%c0_52, %c0_53, %c0_54], %55 {strides = array<i32>} : memref<2x8x32xf32, #tpu.memory_space<vmem>>, vector<2x8x32xf32>,
    } else {
    }
    %c0 = arith.constant 0 : index
    %c0_1 = arith.constant 0 : index
    %c0_2 = arith.constant 0 : index
    %3 = vector.load %arg3[%c0, %c0_1, %c0_2] : memref<2x16x64xbf16, #tpu.memory_space<vmem>>, vector<2x16x64xbf16>
    %4 = vector.shape_cast %3 : vector<2x16x64xbf16> to vector<32x64xbf16>
    %c0_3 = arith.constant 0 : index
    %c0_4 = arith.constant 0 : index
    %5 = vector.load %arg5[%c0_3, %c0_4] : memref<64x32xbf16, #tpu.memory_space<vmem>>, vector<64x32xbf16>
    %cst = arith.constant dense<0.000000e+00> : vector<32x32xf32>
    %6 = tpu.matmul %4, %5, %cst {dimension_numbers = #tpu.dot_dimension_numbers<[1], [0], [0], [1], [0, 0, 1, 1], [], []>} : vector<32x64xbf16>, vector<64x32xbf16>, vector<32x32xf32> -> vector<32x32xf32>
    %c0_5 = arith.constant 0 : index
    %c0_6 = arith.constant 0 : index
    %7 = vector.load %arg6[%c0_5, %c0_6] : memref<64x32xbf16, #tpu.memory_space<vmem>>, vector<64x32xbf16>
    %cst_7 = arith.constant dense<0.000000e+00> : vector<32x32xf32>
    %8 = tpu.matmul %4, %7, %cst_7 {dimension_numbers = #tpu.dot_dimension_numbers<[1], [0], [0], [1], [0, 0, 1, 1], [], []>} : vector<32x64xbf16>, vector<64x32xbf16>, vector<32x32xf32> -> vector<32x32xf32>
    %9 = vector.shape_cast %6 : vector<32x32xf32> to vector<2x16x32xf32>
    %10 = arith.truncf %9 : vector<2x16x32xf32> to vector<2x16x32xbf16>
    %11 = vector.shape_cast %8 : vector<32x32xf32> to vector<2x16x32xf32>
    %12 = arith.truncf %11 : vector<2x16x32xf32> to vector<2x16x32xbf16>
    %c0_8 = arith.constant 0 : index
    %c0_9 = arith.constant 0 : index
    %13 = vector.load %arg11[%c0_8, %c0_9] : memref<16x32xbf16, #tpu.memory_space<vmem>>, vector<16x32xbf16>
    %14 = vector.shape_cast %13 : vector<16x32xbf16> to vector<2x8x32xbf16>
    "tpu.trace_start"() <{level = 10 : i32, message = "bld,bsd->bls"}> : () -> ()
    %cst_10 = arith.constant dense<0.000000e+00> : vector<2x8x16xf32>
    %15 = tpu.matmul %14, %10, %cst_10 {dimension_numbers = #tpu.dot_dimension_numbers<[2], [2], [1], [1], [0, 0, 0, 1, 1, 1], [0], [0]>} : vector<2x8x32xbf16>, vector<2x16x32xbf16>, vector<2x8x16xf32> -> vector<2x8x16xf32>
    "tpu.trace_stop"() : () -> ()
    %c0_11 = arith.constant 0 : index
    %c0_12 = arith.constant 0 : index
    %c0_13 = arith.constant 0 : index
    %16 = vector.load %arg12[%c0_11, %c0_12, %c0_13] : memref<2x8x1xf32, #tpu.memory_space<vmem>>, vector<2x8x1xf32>
    %cst_14 = arith.constant dense<0xFF800000> : vector<2x8xf32>
    %17 = vector.multi_reduction <maximumf>, %15, %cst_14 [2] : vector<2x8x16xf32> to vector<2x8xf32>
    %18 = vector.shape_cast %17 : vector<2x8xf32> to vector<2x8x1xf32>
    %19 = arith.maximumf %16, %18 : vector<2x8x1xf32>
    %20 = arith.subf %16, %19 : vector<2x8x1xf32>
    %21 = math.exp %20 : vector<2x8x1xf32>
    %22 = vector.broadcast %19 : vector<2x8x1xf32> to vector<2x8x16xf32>
    %23 = arith.subf %15, %22 : vector<2x8x16xf32>
    %24 = math.exp %23 : vector<2x8x16xf32>
    %c0_15 = arith.constant 0 : index
    %c0_16 = arith.constant 0 : index
    %c0_17 = arith.constant 0 : index
    %25 = vector.load %arg13[%c0_15, %c0_16, %c0_17] : memref<2x8x1xf32, #tpu.memory_space<vmem>>, vector<2x8x1xf32>
    %26 = arith.mulf %21, %25 : vector<2x8x1xf32>
    %cst_18 = arith.constant dense<0.000000e+00> : vector<2x8xf32>
    %27 = vector.multi_reduction <add>, %24, %cst_18 [2] : vector<2x8x16xf32> to vector<2x8xf32>
    %28 = vector.shape_cast %27 : vector<2x8xf32> to vector<2x8x1xf32>
    %29 = arith.addf %26, %28 : vector<2x8x1xf32>
    %c0_19 = arith.constant 0 : index
    %c0_20 = arith.constant 0 : index
    %c0_21 = arith.constant 0 : index
    %30 = vector.load %arg13[%c0_19, %c0_20, %c0_21] : memref<2x8x1xf32, #tpu.memory_space<vmem>>, vector<2x8x1xf32>
    tpu.vector_store %arg13[%c0_19, %c0_20, %c0_21], %29 {strides = array<i32>} : memref<2x8x1xf32, #tpu.memory_space<vmem>>, vector<2x8x1xf32>,
    %c0_22 = arith.constant 0 : index
    %c0_23 = arith.constant 0 : index
    %c0_24 = arith.constant 0 : index
    %31 = vector.load %arg14[%c0_22, %c0_23, %c0_24] : memref<2x8x32xf32, #tpu.memory_space<vmem>>, vector<2x8x32xf32>
    %32 = vector.broadcast %21 : vector<2x8x1xf32> to vector<2x8x32xf32>
    %33 = arith.mulf %32, %31 : vector<2x8x32xf32>
    %34 = arith.truncf %24 : vector<2x8x16xf32> to vector<2x8x16xbf16>
    "tpu.trace_start"() <{level = 10 : i32, message = "bls,bsd->bld"}> : () -> ()
    %cst_25 = arith.constant dense<0.000000e+00> : vector<2x8x32xf32>
    %35 = tpu.matmul %34, %12, %cst_25 {dimension_numbers = #tpu.dot_dimension_numbers<[2], [1], [1], [2], [0, 0, 0, 1, 1, 2], [0], [0]>} : vector<2x8x16xbf16>, vector<2x16x32xbf16>, vector<2x8x32xf32> -> vector<2x8x32xf32>
    "tpu.trace_stop"() : () -> ()
    %36 = arith.addf %33, %35 : vector<2x8x32xf32>
    %c0_26 = arith.constant 0 : index
    %c0_27 = arith.constant 0 : index
    %c0_28 = arith.constant 0 : index
    %37 = vector.load %arg14[%c0_26, %c0_27, %c0_28] : memref<2x8x32xf32, #tpu.memory_space<vmem>>, vector<2x8x32xf32>
    tpu.vector_store %arg14[%c0_26, %c0_27, %c0_28], %36 {strides = array<i32>} : memref<2x8x32xf32, #tpu.memory_space<vmem>>, vector<2x8x32xf32>,
    %c0_29 = arith.constant 0 : index
    %c0_30 = arith.constant 0 : index
    %c0_31 = arith.constant 0 : index
    %38 = vector.load %arg12[%c0_29, %c0_30, %c0_31] : memref<2x8x1xf32, #tpu.memory_space<vmem>>, vector<2x8x1xf32>
    tpu.vector_store %arg12[%c0_29, %c0_30, %c0_31], %19 {strides = array<i32>} : memref<2x8x1xf32, #tpu.memory_space<vmem>>, vector<2x8x1xf32>,
    %c0_i32_32 = arith.constant 0 : i32
    %39 = arith.cmpi eq, %arg1, %c0_i32_32 : i32
    %40 = arith.extui %39 : i1 to i32
    %c0_i32_33 = arith.constant 0 : i32
    %41 = arith.cmpi ne, %40, %c0_i32_33 : i32
    scf.if %41 {
      %c0_34 = arith.constant 0 : index
      %c0_35 = arith.constant 0 : index
      %c0_36 = arith.constant 0 : index
      %42 = vector.load %arg13[%c0_34, %c0_35, %c0_36] : memref<2x8x1xf32, #tpu.memory_space<vmem>>, vector<2x8x1xf32>
      %43 = tpu.reciprocal %42 {approx = true} : vector<2x8x1xf32> -> vector<2x8x1xf32>
      %c0_37 = arith.constant 0 : index
      %c0_38 = arith.constant 0 : index
      %c0_39 = arith.constant 0 : index
      %44 = vector.load %arg14[%c0_37, %c0_38, %c0_39] : memref<2x8x32xf32, #tpu.memory_space<vmem>>, vector<2x8x32xf32>
      %45 = vector.broadcast %43 : vector<2x8x1xf32> to vector<2x8x32xf32>
      %46 = arith.mulf %44, %45 : vector<2x8x32xf32>
      %47 = vector.shape_cast %46 : vector<2x8x32xf32> to vector<16x32xf32>
      %c0_40 = arith.constant 0 : index
      %c0_41 = arith.constant 0 : index
      %48 = vector.load %arg9[%c0_40, %c0_41] : memref<4x32xf32, #tpu.memory_space<vmem>>, vector<4x32xf32>
      %49 = vector.extract_strided_slice %48 {offsets = [0, 0], sizes = [1, 32], strides = [1, 1]} : vector<4x32xf32> to vector<1x32xf32>
      %50 = vector.extract_strided_slice %48 {offsets = [1, 0], sizes = [1, 32], strides = [1, 1]} : vector<4x32xf32> to vector<1x32xf32>
      %51 = vector.extract_strided_slice %48 {offsets = [2, 0], sizes = [1, 32], strides = [1, 1]} : vector<4x32xf32> to vector<1x32xf32>
      %52 = vector.extract_strided_slice %48 {offsets = [3, 0], sizes = [1, 32], strides = [1, 1]} : vector<4x32xf32> to vector<1x32xf32>
      %53 = arith.truncf %47 : vector<16x32xf32> to vector<16x32xbf16>
      %c0_42 = arith.constant 0 : index
      %c0_43 = arith.constant 0 : index
      %54 = vector.load %arg7[%c0_42, %c0_43] : memref<32x32xbf16, #tpu.memory_space<vmem>>, vector<32x32xbf16>
      %cst_44 = arith.constant dense<0.000000e+00> : vector<16x32xf32>
      %55 = tpu.matmul %53, %54, %cst_44 {dimension_numbers = #tpu.dot_dimension_numbers<[1], [0], [0], [1], [0, 0, 1, 1], [], []>} : vector<16x32xbf16>, vector<32x32xbf16>, vector<16x32xf32> -> vector<16x32xf32>
      %56 = vector.broadcast %49 : vector<1x32xf32> to vector<16x32xf32>
      %57 = arith.addf %55, %56 : vector<16x32xf32>
      %cst_45 = arith.constant 5.000000e-01 : f32
      %58 = vector.broadcast %cst_45 : f32 to vector<16x32xf32>
      %59 = arith.mulf %58, %57 : vector<16x32xf32>
      %cst_46 = arith.constant 0.707106769 : f32
      %60 = vector.broadcast %cst_46 : f32 to vector<16x32xf32>
      %61 = arith.mulf %57, %60 : vector<16x32xf32>
      %62 = math.erf %61 : vector<16x32xf32>
      %cst_47 = arith.constant 1.000000e+00 : f32
      %63 = vector.broadcast %cst_47 : f32 to vector<16x32xf32>
      %64 = arith.addf %63, %62 : vector<16x32xf32>
      %65 = arith.mulf %59, %64 : vector<16x32xf32>
      %66 = arith.truncf %65 : vector<16x32xf32> to vector<16x32xbf16>
      %c0_48 = arith.constant 0 : index
      %c0_49 = arith.constant 0 : index
      %67 = vector.load %arg8[%c0_48, %c0_49] : memref<32x32xbf16, #tpu.memory_space<vmem>>, vector<32x32xbf16>
      %cst_50 = arith.constant dense<0.000000e+00> : vector<16x32xf32>
      %68 = tpu.matmul %66, %67, %cst_50 {dimension_numbers = #tpu.dot_dimension_numbers<[1], [0], [0], [1], [0, 0, 1, 1], [], []>} : vector<16x32xbf16>, vector<32x32xbf16>, vector<16x32xf32> -> vector<16x32xf32>
      %69 = vector.broadcast %50 : vector<1x32xf32> to vector<16x32xf32>
      %70 = arith.addf %68, %69 : vector<16x32xf32>
      %c0_51 = arith.constant 0 : index
      %c0_52 = arith.constant 0 : index
      %c0_53 = arith.constant 0 : index
      %71 = vector.load %arg2[%c0_51, %c0_52, %c0_53] : memref<2x8x32xf32, #tpu.memory_space<vmem>>, vector<2x8x32xf32>
      %72 = vector.shape_cast %71 : vector<2x8x32xf32> to vector<16x32xf32>
      %73 = arith.addf %72, %70 : vector<16x32xf32>
      %cst_54 = arith.constant dense<0.000000e+00> : vector<16xf32>
      %74 = vector.multi_reduction <add>, %73, %cst_54 [1] : vector<16x32xf32> to vector<16xf32>
      %75 = vector.shape_cast %74 : vector<16xf32> to vector<16x1xf32>
      %cst_55 = arith.constant 3.200000e+01 : f32
      %76 = vector.broadcast %cst_55 : f32 to vector<16x1xf32>
      %77 = arith.divf %75, %76 : vector<16x1xf32>
      %78 = vector.broadcast %77 : vector<16x1xf32> to vector<16x32xf32>
      %79 = arith.subf %73, %78 : vector<16x32xf32>
      %80 = arith.mulf %79, %79 : vector<16x32xf32>
      %cst_56 = arith.constant dense<0.000000e+00> : vector<16xf32>
      %81 = vector.multi_reduction <add>, %80, %cst_56 [1] : vector<16x32xf32> to vector<16xf32>
      %82 = vector.shape_cast %81 : vector<16xf32> to vector<16x1xf32>
      %cst_57 = arith.constant 3.200000e+01 : f32
      %83 = vector.broadcast %cst_57 : f32 to vector<16x1xf32>
      %84 = arith.divf %82, %83 : vector<16x1xf32>
      %85 = vector.broadcast %77 : vector<16x1xf32> to vector<16x32xf32>
      %86 = arith.subf %73, %85 : vector<16x32xf32>
      %cst_58 = arith.constant 9.99999974E-6 : f32
      %87 = vector.broadcast %cst_58 : f32 to vector<16x1xf32>
      %88 = arith.addf %84, %87 : vector<16x1xf32>
      %89 = math.rsqrt %88 : vector<16x1xf32>
      %90 = vector.broadcast %89 : vector<16x1xf32> to vector<16x32xf32>
      %91 = arith.mulf %86, %90 : vector<16x32xf32>
      %92 = vector.broadcast %51 : vector<1x32xf32> to vector<16x32xf32>
      %93 = arith.mulf %91, %92 : vector<16x32xf32>
      %94 = vector.broadcast %52 : vector<1x32xf32> to vector<16x32xf32>
      %95 = arith.addf %93, %94 : vector<16x32xf32>
      %96 = vector.shape_cast %95 : vector<16x32xf32> to vector<2x8x32xf32>
      %c0_59 = arith.constant 0 : index
      %c0_60 = arith.constant 0 : index
      %c0_61 = arith.constant 0 : index
      %97 = vector.load %arg10[%c0_59, %c0_60, %c0_61] : memref<2x8x32xf32, #tpu.memory_space<vmem>>, vector<2x8x32xf32>
      tpu.vector_store %arg10[%c0_59, %c0_60, %c0_61], %96 {strides = array<i32>} : memref<2x8x32xf32, #tpu.memory_space<vmem>>, vector<2x8x32xf32>,
    } else {
    }
    return
  }
  func.func @transform_0(%arg0: i32, %arg1: i32) -> (i32, i32, i32) {
    %c0_i32 = arith.constant 0 : i32
    %c0_i32_0 = arith.constant 0 : i32
    %c0_i32_1 = arith.constant 0 : i32
    return %arg0, %c0_i32, %c0_i32_0 : i32, i32, i32
  }
  func.func @transform_1(%arg0: i32, %arg1: i32) -> (i32, i32, i32) {
    %c0_i32 = arith.constant 0 : i32
    %c0_i32_0 = arith.constant 0 : i32
    return %arg0, %arg1, %c0_i32 : i32, i32, i32
  }
  func.func @transform_2(%arg0: i32, %arg1: i32) -> (i32, i32) {
    %c0_i32 = arith.constant 0 : i32
    %c0_i32_0 = arith.constant 0 : i32
    %c0_i32_1 = arith.constant 0 : i32
    return %c0_i32, %c0_i32_0 : i32, i32
  }
  func.func @transform_3(%arg0: i32, %arg1: i32) -> (i32, i32) {
    %c0_i32 = arith.constant 0 : i32
    %c0_i32_0 = arith.constant 0 : i32
    %c0_i32_1 = arith.constant 0 : i32
    return %c0_i32, %c0_i32_0 : i32, i32
  }
  func.func @transform_4(%arg0: i32, %arg1: i32) -> (i32, i32) {
    %c0_i32 = arith.constant 0 : i32
    %c0_i32_0 = arith.constant 0 : i32
    %c0_i32_1 = arith.constant 0 : i32
    return %c0_i32, %c0_i32_0 : i32, i32
  }
  func.func @transform_5(%arg0: i32, %arg1: i32) -> (i32, i32) {
    %c0_i32 = arith.constant 0 : i32
    %c0_i32_0 = arith.constant 0 : i32
    %c0_i32_1 = arith.constant 0 : i32
    return %c0_i32, %c0_i32_0 : i32, i32
  }
  func.func @transform_6(%arg0: i32, %arg1: i32) -> (i32, i32) {
    %c0_i32 = arith.constant 0 : i32
    %c0_i32_0 = arith.constant 0 : i32
    %c0_i32_1 = arith.constant 0 : i32
    return %c0_i32, %c0_i32_0 : i32, i32
  }
  func.func @transform_7(%arg0: i32, %arg1: i32) -> (i32, i32) {
    %c0_i32 = arith.constant 0 : i32
    %c0_i32_0 = arith.constant 0 : i32
    %c0_i32_1 = arith.constant 0 : i32
    return %c0_i32, %c0_i32_0 : i32, i32
  }
  func.func @transform_8(%arg0: i32, %arg1: i32) -> (i32, i32, i32) {
    %c0_i32 = arith.constant 0 : i32
    %c0_i32_0 = arith.constant 0 : i32
    %c0_i32_1 = arith.constant 0 : i32
    return %arg0, %c0_i32, %c0_i32_0 : i32, i32, i32
  }
}

module attributes {stable_mosaic.version = 11 : i64} {
  func.func @_perceiver_kernel(%arg0: i32, %arg1: i32, %arg2: memref<2x8x32xf32, #tpu.memory_space<vmem>>, %arg3: memref<2x16x64xbf16, #tpu.memory_space<vmem>>, %arg4: memref<32x32xbf16, #tpu.memory_space<vmem>>, %arg5: memref<64x32xbf16, #tpu.memory_space<vmem>>, %arg6: memref<64x32xbf16, #tpu.memory_space<vmem>>, %arg7: memref<32x32xbf16, #tpu.memory_space<vmem>>, %arg8: memref<32x32xbf16, #tpu.memory_space<vmem>>, %arg9: memref<4x32xf32, #tpu.memory_space<vmem>>, %arg10: memref<2x8x32xf32, #tpu.memory_space<vmem>>, %arg11: memref<16x32xbf16, #tpu.memory_space<vmem>>, %arg12: memref<2x8x1xf32, #tpu.memory_space<vmem>>, %arg13: memref<2x8x1xf32, #tpu.memory_space<vmem>>, %arg14: memref<2x8x32xf32, #tpu.memory_space<vmem>>) attributes {dimension_semantics = [#tpu.dimension_semantics<parallel>, #tpu.dimension_semantics<arbitrary>], iteration_bounds = array<i64: 1, 1>, scalar_prefetch = 0 : i64, scratch_operands = 4 : i64, tpu.core_type = #tpu.core_type<tc>, window_params = [{transform_indices = @transform_0, window_bounds = array<i64: 2, 8, 32>}, {transform_indices = @transform_1, window_bounds = array<i64: 2, 16, 64>}, {pipeline_mode = #tpu.pipeline_mode<synchronous>, transform_indices = @transform_2, window_bounds = array<i64: 32, 32>}, {pipeline_mode = #tpu.pipeline_mode<synchronous>, transform_indices = @transform_3, window_bounds = array<i64: 64, 32>}, {pipeline_mode = #tpu.pipeline_mode<synchronous>, transform_indices = @transform_4, window_bounds = array<i64: 64, 32>}, {pipeline_mode = #tpu.pipeline_mode<synchronous>, transform_indices = @transform_5, window_bounds = array<i64: 32, 32>}, {pipeline_mode = #tpu.pipeline_mode<synchronous>, transform_indices = @transform_6, window_bounds = array<i64: 32, 32>}, {pipeline_mode = #tpu.pipeline_mode<synchronous>, transform_indices = @transform_7, window_bounds = array<i64: 4, 32>}, {transform_indices = @transform_8, window_bounds = array<i64: 2, 8, 32>}]} {
    %c0_i32 = arith.constant 0 : i32
    %0 = arith.cmpi eq, %arg1, %c0_i32 : i32
    %1 = arith.extui %0 : i1 to i32
    %c0_i32_0 = arith.constant 0 : i32
    %2 = arith.cmpi ne, %1, %c0_i32_0 : i32
    scf.if %2 {
      %c0_34 = arith.constant 0 : index
      %c0_35 = arith.constant 0 : index
      %c0_36 = arith.constant 0 : index
      %42 = vector.load %arg2[%c0_34, %c0_35, %c0_36] : memref<2x8x32xf32, #tpu.memory_space<vmem>>, vector<2x8x32xf32>
      %43 = vector.shape_cast %42 : vector<2x8x32xf32> to vector<16x32xf32>
      %44 = arith.truncf %43 : vector<16x32xf32> to vector<16x32xbf16>
      %c0_37 = arith.constant 0 : index
      %c0_38 = arith.constant 0 : index
      %45 = vector.load %arg4[%c0_37, %c0_38] : memref<32x32xbf16, #tpu.memory_space<vmem>>, vector<32x32xbf16>
      %cst_39 = arith.constant dense<0.000000e+00> : vector<16x32xf32>
      %46 = tpu.matmul %44, %45, %cst_39 {dimension_numbers = #tpu.dot_dimension_numbers<[1], [0], [0], [1], [0, 0, 1, 1], [], []>} : vector<16x32xbf16>, vector<32x32xbf16>, vector<16x32xf32> -> vector<16x32xf32>
      %cst_40 = arith.constant 0.176776692 : f32
      %47 = vector.broadcast %cst_40 : f32 to vector<16x32xf32>
      %48 = arith.mulf %46, %47 : vector<16x32xf32>
      %49 = arith.truncf %48 : vector<16x32xf32> to vector<16x32xbf16>
      %c0_41 = arith.constant 0 : index
      %c0_42 = arith.constant 0 : index
      %50 = vector.load %arg11[%c0_41, %c0_42] : memref<16x32xbf16, #tpu.memory_space<vmem>>, vector<16x32xbf16>
      tpu.vector_store %arg11[%c0_41, %c0_42], %49 {strides = array<i32>} : memref<16x32xbf16, #tpu.memory_space<vmem>>, vector<16x32xbf16>,
      %cst_43 = arith.constant 0xFF800000 : f32
      %51 = vector.broadcast %cst_43 : f32 to vector<2x8x1xf32>
      %c0_44 = arith.constant 0 : index
      %c0_45 = arith.constant 0 : index
      %c0_46 = arith.constant 0 : index
      %52 = vector.load %arg12[%c0_44, %c0_45, %c0_46] : memref<2x8x1xf32, #tpu.memory_space<vmem>>, vector<2x8x1xf32>
      tpu.vector_store %arg12[%c0_44, %c0_45, %c0_46], %51 {strides = array<i32>} : memref<2x8x1xf32, #tpu.memory_space<vmem>>, vector<2x8x1xf32>,
      %cst_47 = arith.constant 0.000000e+00 : f32
      %53 = vector.broadcast %cst_47 : f32 to vector<2x8x1xf32>
      %c0_48 = arith.constant 0 : index
      %c0_49 = arith.constant 0 : index
      %c0_50 = arith.constant 0 : index
      %54 = vector.load %arg13[%c0_48, %c0_49, %c0_50] : memref<2x8x1xf32, #tpu.memory_space<vmem>>, vector<2x8x1xf32>
      tpu.vector_store %arg13[%c0_48, %c0_49, %c0_50], %53 {strides = array<i32>} : memref<2x8x1xf32, #tpu.memory_space<vmem>>, vector<2x8x1xf32>,
      %cst_51 = arith.constant 0.000000e+00 : f32
      %55 = vector.broadcast %cst_51 : f32 to vector<2x8x32xf32>
      %c0_52 = arith.constant 0 : index
      %c0_53 = arith.constant 0 : index
      %c0_54 = arith.constant 0 : index
      %56 = vector.load %arg14[%c0_52, %c0_53, %c0_54] : memref<2x8x32xf32, #tpu.memory_space<vmem>>, vector<2x8x32xf32>
      tpu.vector_store %arg14[%c0_52, %c0_53, %c0_54], %55 {strides = array<i32>} : memref<2x8x32xf32, #tpu.memory_space<vmem>>, vector<2x8x32xf32>,
    } else {
    }
    %c0 = arith.constant 0 : index
    %c0_1 = arith.constant 0 : index
    %c0_2 = arith.constant 0 : index
    %3 = vector.load %arg3[%c0, %c0_1, %c0_2] : memref<2x16x64xbf16, #tpu.memory_space<vmem>>, vector<2x16x64xbf16>
    %4 = vector.shape_cast %3 : vector<2x16x64xbf16> to vector<32x64xbf16>
    %c0_3 = arith.constant 0 : index
    %c0_4 = arith.constant 0 : index
    %5 = vector.load %arg5[%c0_3, %c0_4] : memref<64x32xbf16, #tpu.memory_space<vmem>>, vector<64x32xbf16>
    %cst = arith.constant dense<0.000000e+00> : vector<32x32xf32>
    %6 = tpu.matmul %4, %5, %cst {dimension_numbers = #tpu.dot_dimension_numbers<[1], [0], [0], [1], [0, 0, 1, 1], [], []>} : vector<32x64xbf16>, vector<64x32xbf16>, vector<32x32xf32> -> vector<32x32xf32>
    %c0_5 = arith.constant 0 : index
    %c0_6 = arith.constant 0 : index
    %7 = vector.load %arg6[%c0_5, %c0_6] : memref<64x32xbf16, #tpu.memory_space<vmem>>, vector<64x32xbf16>
    %cst_7 = arith.constant dense<0.000000e+00> : vector<32x32xf32>
    %8 = tpu.matmul %4, %7, %cst_7 {dimension_numbers = #tpu.dot_dimension_numbers<[1], [0], [0], [1], [0, 0, 1, 1], [], []>} : vector<32x64xbf16>, vector<64x32xbf16>, vector<32x32xf32> -> vector<32x32xf32>
    %9 = vector.shape_cast %6 : vector<32x32xf32> to vector<2x16x32xf32>
    %10 = arith.truncf %9 : vector<2x16x32xf32> to vector<2x16x32xbf16>
    %11 = vector.shape_cast %8 : vector<32x32xf32> to vector<2x16x32xf32>
    %12 = arith.truncf %11 : vector<2x16x32xf32> to vector<2x16x32xbf16>
    %c0_8 = arith.constant 0 : index
    %c0_9 = arith.constant 0 : index
    %13 = vector.load %arg11[%c0_8, %c0_9] : memref<16x32xbf16, #tpu.memory_space<vmem>>, vector<16x32xbf16>
    %14 = vector.shape_cast %13 : vector<16x32xbf16> to vector<2x8x32xbf16>
    "tpu.trace_start"() <{level = 10 : i32, message = "bld,bsd->bls"}> : () -> ()
    %cst_10 = arith.constant dense<0.000000e+00> : vector<2x8x16xf32>
    %15 = tpu.matmul %14, %10, %cst_10 {dimension_numbers = #tpu.dot_dimension_numbers<[2], [2], [1], [1], [0, 0, 0, 1, 1, 1], [0], [0]>} : vector<2x8x32xbf16>, vector<2x16x32xbf16>, vector<2x8x16xf32> -> vector<2x8x16xf32>
    "tpu.trace_stop"() : () -> ()
    %c0_11 = arith.constant 0 : index
    %c0_12 = arith.constant 0 : index
    %c0_13 = arith.constant 0 : index
    %16 = vector.load %arg12[%c0_11, %c0_12, %c0_13] : memref<2x8x1xf32, #tpu.memory_space<vmem>>, vector<2x8x1xf32>
    %cst_14 = arith.constant dense<0xFF800000> : vector<2x8xf32>
    %17 = vector.multi_reduction <maximumf>, %15, %cst_14 [2] : vector<2x8x16xf32> to vector<2x8xf32>
    %18 = vector.shape_cast %17 : vector<2x8xf32> to vector<2x8x1xf32>
    %19 = arith.maximumf %16, %18 : vector<2x8x1xf32>
    %20 = arith.subf %16, %19 : vector<2x8x1xf32>
    %21 = math.exp %20 : vector<2x8x1xf32>
    %22 = vector.broadcast %19 : vector<2x8x1xf32> to vector<2x8x16xf32>
    %23 = arith.subf %15, %22 : vector<2x8x16xf32>
    %24 = math.exp %23 : vector<2x8x16xf32>
    %c0_15 = arith.constant 0 : index
    %c0_16 = arith.constant 0 : index
    %c0_17 = arith.constant 0 : index
    %25 = vector.load %arg13[%c0_15, %c0_16, %c0_17] : memref<2x8x1xf32, #tpu.memory_space<vmem>>, vector<2x8x1xf32>
    %26 = arith.mulf %21, %25 : vector<2x8x1xf32>
    %cst_18 = arith.constant dense<0.000000e+00> : vector<2x8xf32>
    %27 = vector.multi_reduction <add>, %24, %cst_18 [2] : vector<2x8x16xf32> to vector<2x8xf32>
    %28 = vector.shape_cast %27 : vector<2x8xf32> to vector<2x8x1xf32>
    %29 = arith.addf %26, %28 : vector<2x8x1xf32>
    %c0_19 = arith.constant 0 : index
    %c0_20 = arith.constant 0 : index
    %c0_21 = arith.constant 0 : index
    %30 = vector.load %arg13[%c0_19, %c0_20, %c0_21] : memref<2x8x1xf32, #tpu.memory_space<vmem>>, vector<2x8x1xf32>
    tpu.vector_store %arg13[%c0_19, %c0_20, %c0_21], %29 {strides = array<i32>} : memref<2x8x1xf32, #tpu.memory_space<vmem>>, vector<2x8x1xf32>,
    %c0_22 = arith.constant 0 : index
    %c0_23 = arith.constant 0 : index
    %c0_24 = arith.constant 0 : index
    %31 = vector.load %arg14[%c0_22, %c0_23, %c0_24] : memref<2x8x32xf32, #tpu.memory_space<vmem>>, vector<2x8x32xf32>
    %32 = vector.broadcast %21 : vector<2x8x1xf32> to vector<2x8x32xf32>
    %33 = arith.mulf %32, %31 : vector<2x8x32xf32>
    %34 = arith.truncf %24 : vector<2x8x16xf32> to vector<2x8x16xbf16>
    "tpu.trace_start"() <{level = 10 : i32, message = "bls,bsd->bld"}> : () -> ()
    %cst_25 = arith.constant dense<0.000000e+00> : vector<2x8x32xf32>
    %35 = tpu.matmul %34, %12, %cst_25 {dimension_numbers = #tpu.dot_dimension_numbers<[2], [1], [1], [2], [0, 0, 0, 1, 1, 2], [0], [0]>} : vector<2x8x16xbf16>, vector<2x16x32xbf16>, vector<2x8x32xf32> -> vector<2x8x32xf32>
    "tpu.trace_stop"() : () -> ()
    %36 = arith.addf %33, %35 : vector<2x8x32xf32>
    %c0_26 = arith.constant 0 : index
    %c0_27 = arith.constant 0 : index
    %c0_28 = arith.constant 0 : index
    %37 = vector.load %arg14[%c0_26, %c0_27, %c0_28] : memref<2x8x32xf32, #tpu.memory_space<vmem>>, vector<2x8x32xf32>
    tpu.vector_store %arg14[%c0_26, %c0_27, %c0_28], %36 {strides = array<i32>} : memref<2x8x32xf32, #tpu.memory_space<vmem>>, vector<2x8x32xf32>,
    %c0_29 = arith.constant 0 : index
    %c0_30 = arith.constant 0 : index
    %c0_31 = arith.constant 0 : index
    %38 = vector.load %arg12[%c0_29, %c0_30, %c0_31] : memref<2x8x1xf32, #tpu.memory_space<vmem>>, vector<2x8x1xf32>
    tpu.vector_store %arg12[%c0_29, %c0_30, %c0_31], %19 {strides = array<i32>} : memref<2x8x1xf32, #tpu.memory_space<vmem>>, vector<2x8x1xf32>,
    %c0_i32_32 = arith.constant 0 : i32
    %39 = arith.cmpi eq, %arg1, %c0_i32_32 : i32
    %40 = arith.extui %39 : i1 to i32
    %c0_i32_33 = arith.constant 0 : i32
    %41 = arith.cmpi ne, %40, %c0_i32_33 : i32
    scf.if %41 {
      %c0_34 = arith.constant 0 : index
      %c0_35 = arith.constant 0 : index
      %c0_36 = arith.constant 0 : index
      %42 = vector.load %arg13[%c0_34, %c0_35, %c0_36] : memref<2x8x1xf32, #tpu.memory_space<vmem>>, vector<2x8x1xf32>
      %43 = tpu.reciprocal %42 {approx = true} : vector<2x8x1xf32> -> vector<2x8x1xf32>
      %c0_37 = arith.constant 0 : index
      %c0_38 = arith.constant 0 : index
      %c0_39 = arith.constant 0 : index
      %44 = vector.load %arg14[%c0_37, %c0_38, %c0_39] : memref<2x8x32xf32, #tpu.memory_space<vmem>>, vector<2x8x32xf32>
      %45 = vector.broadcast %43 : vector<2x8x1xf32> to vector<2x8x32xf32>
      %46 = arith.mulf %44, %45 : vector<2x8x32xf32>
      %47 = vector.shape_cast %46 : vector<2x8x32xf32> to vector<16x32xf32>
      %c0_40 = arith.constant 0 : index
      %c0_41 = arith.constant 0 : index
      %48 = vector.load %arg9[%c0_40, %c0_41] : memref<4x32xf32, #tpu.memory_space<vmem>>, vector<4x32xf32>
      %49 = vector.extract_strided_slice %48 {offsets = [0, 0], sizes = [1, 32], strides = [1, 1]} : vector<4x32xf32> to vector<1x32xf32>
      %50 = vector.extract_strided_slice %48 {offsets = [1, 0], sizes = [1, 32], strides = [1, 1]} : vector<4x32xf32> to vector<1x32xf32>
      %51 = vector.extract_strided_slice %48 {offsets = [2, 0], sizes = [1, 32], strides = [1, 1]} : vector<4x32xf32> to vector<1x32xf32>
      %52 = vector.extract_strided_slice %48 {offsets = [3, 0], sizes = [1, 32], strides = [1, 1]} : vector<4x32xf32> to vector<1x32xf32>
      %53 = arith.truncf %47 : vector<16x32xf32> to vector<16x32xbf16>
      %c0_42 = arith.constant 0 : index
      %c0_43 = arith.constant 0 : index
      %54 = vector.load %arg7[%c0_42, %c0_43] : memref<32x32xbf16, #tpu.memory_space<vmem>>, vector<32x32xbf16>
      %cst_44 = arith.constant dense<0.000000e+00> : vector<16x32xf32>
      %55 = tpu.matmul %53, %54, %cst_44 {dimension_numbers = #tpu.dot_dimension_numbers<[1], [0], [0], [1], [0, 0, 1, 1], [], []>} : vector<16x32xbf16>, vector<32x32xbf16>, vector<16x32xf32> -> vector<16x32xf32>
      %56 = vector.broadcast %49 : vector<1x32xf32> to vector<16x32xf32>
      %57 = arith.addf %55, %56 : vector<16x32xf32>
      %cst_45 = arith.constant 5.000000e-01 : f32
      %58 = vector.broadcast %cst_45 : f32 to vector<16x32xf32>
      %59 = arith.mulf %58, %57 : vector<16x32xf32>
      %cst_46 = arith.constant 0.707106769 : f32
      %60 = vector.broadcast %cst_46 : f32 to vector<16x32xf32>
      %61 = arith.mulf %57, %60 : vector<16x32xf32>
      %62 = math.erf %61 : vector<16x32xf32>
      %cst_47 = arith.constant 1.000000e+00 : f32
      %63 = vector.broadcast %cst_47 : f32 to vector<16x32xf32>
      %64 = arith.addf %63, %62 : vector<16x32xf32>
      %65 = arith.mulf %59, %64 : vector<16x32xf32>
      %66 = arith.truncf %65 : vector<16x32xf32> to vector<16x32xbf16>
      %c0_48 = arith.constant 0 : index
      %c0_49 = arith.constant 0 : index
      %67 = vector.load %arg8[%c0_48, %c0_49] : memref<32x32xbf16, #tpu.memory_space<vmem>>, vector<32x32xbf16>
      %cst_50 = arith.constant dense<0.000000e+00> : vector<16x32xf32>
      %68 = tpu.matmul %66, %67, %cst_50 {dimension_numbers = #tpu.dot_dimension_numbers<[1], [0], [0], [1], [0, 0, 1, 1], [], []>} : vector<16x32xbf16>, vector<32x32xbf16>, vector<16x32xf32> -> vector<16x32xf32>
      %69 = vector.broadcast %50 : vector<1x32xf32> to vector<16x32xf32>
      %70 = arith.addf %68, %69 : vector<16x32xf32>
      %c0_51 = arith.constant 0 : index
      %c0_52 = arith.constant 0 : index
      %c0_53 = arith.constant 0 : index
      %71 = vector.load %arg2[%c0_51, %c0_52, %c0_53] : memref<2x8x32xf32, #tpu.memory_space<vmem>>, vector<2x8x32xf32>
      %72 = vector.shape_cast %71 : vector<2x8x32xf32> to vector<16x32xf32>
      %73 = arith.addf %72, %70 : vector<16x32xf32>
      %cst_54 = arith.constant dense<0.000000e+00> : vector<16xf32>
      %74 = vector.multi_reduction <add>, %73, %cst_54 [1] : vector<16x32xf32> to vector<16xf32>
      %75 = vector.shape_cast %74 : vector<16xf32> to vector<16x1xf32>
      %cst_55 = arith.constant 3.200000e+01 : f32
      %76 = vector.broadcast %cst_55 : f32 to vector<16x1xf32>
      %77 = arith.divf %75, %76 : vector<16x1xf32>
      %78 = vector.broadcast %77 : vector<16x1xf32> to vector<16x32xf32>
      %79 = arith.subf %73, %78 : vector<16x32xf32>
      %80 = arith.mulf %79, %79 : vector<16x32xf32>
      %cst_56 = arith.constant dense<0.000000e+00> : vector<16xf32>
      %81 = vector.multi_reduction <add>, %80, %cst_56 [1] : vector<16x32xf32> to vector<16xf32>
      %82 = vector.shape_cast %81 : vector<16xf32> to vector<16x1xf32>
      %cst_57 = arith.constant 3.200000e+01 : f32
      %83 = vector.broadcast %cst_57 : f32 to vector<16x1xf32>
      %84 = arith.divf %82, %83 : vector<16x1xf32>
      %85 = vector.broadcast %77 : vector<16x1xf32> to vector<16x32xf32>
      %86 = arith.subf %73, %85 : vector<16x32xf32>
      %cst_58 = arith.constant 9.99999974E-6 : f32
      %87 = vector.broadcast %cst_58 : f32 to vector<16x1xf32>
      %88 = arith.addf %84, %87 : vector<16x1xf32>
      %89 = math.rsqrt %88 : vector<16x1xf32>
      %90 = vector.broadcast %89 : vector<16x1xf32> to vector<16x32xf32>
      %91 = arith.mulf %86, %90 : vector<16x32xf32>
      %92 = vector.broadcast %51 : vector<1x32xf32> to vector<16x32xf32>
      %93 = arith.mulf %91, %92 : vector<16x32xf32>
      %94 = vector.broadcast %52 : vector<1x32xf32> to vector<16x32xf32>
      %95 = arith.addf %93, %94 : vector<16x32xf32>
      %96 = vector.shape_cast %95 : vector<16x32xf32> to vector<2x8x32xf32>
      %c0_59 = arith.constant 0 : index
      %c0_60 = arith.constant 0 : index
      %c0_61 = arith.constant 0 : index
      %97 = vector.load %arg10[%c0_59, %c0_60, %c0_61] : memref<2x8x32xf32, #tpu.memory_space<vmem>>, vector<2x8x32xf32>
      tpu.vector_store %arg10[%c0_59, %c0_60, %c0_61], %96 {strides = array<i32>} : memref<2x8x32xf32, #tpu.memory_space<vmem>>, vector<2x8x32xf32>,
    } else {
    }
    return
  }
  func.func @transform_0(%arg0: i32, %arg1: i32) -> (i32, i32, i32) {
    %c0_i32 = arith.constant 0 : i32
    %c0_i32_0 = arith.constant 0 : i32
    %c0_i32_1 = arith.constant 0 : i32
    return %arg0, %c0_i32, %c0_i32_0 : i32, i32, i32
  }
  func.func @transform_1(%arg0: i32, %arg1: i32) -> (i32, i32, i32) {
    %c0_i32 = arith.constant 0 : i32
    %c0_i32_0 = arith.constant 0 : i32
    return %arg0, %arg1, %c0_i32 : i32, i32, i32
  }
  func.func @transform_2(%arg0: i32, %arg1: i32) -> (i32, i32) {
    %c0_i32 = arith.constant 0 : i32
    %c0_i32_0 = arith.constant 0 : i32
    %c0_i32_1 = arith.constant 0 : i32
    return %c0_i32, %c0_i32_0 : i32, i32
  }
  func.func @transform_3(%arg0: i32, %arg1: i32) -> (i32, i32) {
    %c0_i32 = arith.constant 0 : i32
    %c0_i32_0 = arith.constant 0 : i32
    %c0_i32_1 = arith.constant 0 : i32
    return %c0_i32, %c0_i32_0 : i32, i32
  }
  func.func @transform_4(%arg0: i32, %arg1: i32) -> (i32, i32) {
    %c0_i32 = arith.constant 0 : i32
    %c0_i32_0 = arith.constant 0 : i32
    %c0_i32_1 = arith.constant 0 : i32
    return %c0_i32, %c0_i32_0 : i32, i32
  }
  func.func @transform_5(%arg0: i32, %arg1: i32) -> (i32, i32) {
    %c0_i32 = arith.constant 0 : i32
    %c0_i32_0 = arith.constant 0 : i32
    %c0_i32_1 = arith.constant 0 : i32
    return %c0_i32, %c0_i32_0 : i32, i32
  }
  func.func @transform_6(%arg0: i32, %arg1: i32) -> (i32, i32) {
    %c0_i32 = arith.constant 0 : i32
    %c0_i32_0 = arith.constant 0 : i32
    %c0_i32_1 = arith.constant 0 : i32
    return %c0_i32, %c0_i32_0 : i32, i32
  }
  func.func @transform_7(%arg0: i32, %arg1: i32) -> (i32, i32) {
    %c0_i32 = arith.constant 0 : i32
    %c0_i32_0 = arith.constant 0 : i32
    %c0_i32_1 = arith.constant 0 : i32
    return %c0_i32, %c0_i32_0 : i32, i32
  }
  func.func @transform_8(%arg0: i32, %arg1: i32) -> (i32, i32, i32) {
    %c0_i32 = arith.constant 0 : i32
    %c0_i32_0 = arith.constant 0 : i32
    %c0_i32_1 = arith.constant 0 : i32
    return %arg0, %c0_i32, %c0_i32_0 : i32, i32, i32
  }
}

</mosaic_0001>

<bundles_post_ra>
// kernel: tpu_custom_call.1
= control target key start
LH: loop header
LB: loop body
LE: loop exit
PB: predicated region body
PF: predicated region fallthrough
CT: control target
= control target key end

     0   :  { %v976_v1 = vmov 0.0   ;;  %vm977_vm0 = vmmov 0   ;;  %vm54_vm1 = vcmask 261120   ;;  %vm156_vm2 = vcmask 523264   ;;  %s1175_s0 = inlined_call_operand.vmem [shape: f32[2,8,32], index: 0, kind: input, shape index: {}]   ;;  %s1176_s1 = inlined_call_operand.vmem [shape: bf16[2,16,64], index: 1, kind: input, shape index: {}]   ;;  %s1177_s2 = inlined_call_operand.vmem [shape: bf16[32,32], index: 2, kind: input, shape index: {}]   ;;  %s1178_s3 = inlined_call_operand.vmem [shape: bf16[64,32], index: 3, kind: input, shape index: {}]   ;;  %s1179_s4 = inlined_call_operand.vmem [shape: bf16[64,32], index: 4, kind: input, shape index: {}]   ;;  %s1180_s5 = inlined_call_operand.vmem [shape: bf16[32,32], index: 5, kind: input, shape index: {}]   ;;  %s1181_s6 = inlined_call_operand.vmem [shape: bf16[32,32], index: 6, kind: input, shape index: {}]   ;;  %s1182_s7 = inlined_call_operand.vmem [shape: f32[4,32], index: 7, kind: input, shape index: {}]   ;;  %s1183_s8 = inlined_call_operand.hbm [shape: f32[2,8,32], index: 8, kind: output, shape index: {}]  }
   0x1   :  { %v914_v0 = vld [vmem:[%s1178_s3] sm:$0xff]   ;;  %833 = vmatprep.subr.bf16.mxu0 %v976_v1  ;;  %v916_v3 = vld [vmem:[%s1178_s3 + $0x8] sm:$0xff]   ;;  %837 = vmatprep.mubr.msk.bf16.mxu0 %vm977_vm0, %v976_v1  ;;  %108 = vst.msk [vmem:[#allocation5] sm:$0xff] %vm54_vm1, %v976_v1  ;;  %109 = vst.msk [vmem:[#allocation5 + $0x8] sm:$0xff] %vm54_vm1, %v976_v1 }
   0x2   :  { %v915_v2 = vld [vmem:[%s1177_s2] sm:$0xff]   ;;  %841 = vmatprep.subr.bf16.mxu1 %v914_v0  ;;  %v917_v4 = vld [vmem:[%s1177_s2 + $0x8] sm:$0xff]   ;;  %v918_v5 = vld [vmem:[%s1178_s3 + $0x10] sm:$0xff]  }
   0x3   :  { %842 = vmatpush3.bf16.msra.mxu1 %v914_v0  ;;  %834 = vmatpush3.bf16.msra.mxu0 %v915_v2  ;;  %v1054_v6 = vld [vmem:[%s1175_s0] sm:$0xff]  ;;  %v1059_v7 = vld [vmem:[%s1175_s0 + $0x8] sm:$0xff]  ;;  %v919_v10 = vld [vmem:[%s1178_s3 + $0x18] sm:$0xff]  }
   0x4   :  { %843 = vmatprep.subr.bf16.mxu1 %v916_v3  ;;  %835 = vmatprep.subr.bf16.mxu0 %v976_v1  ;;  %v37_v8 = vpack.c.bf16 %v1059_v7, %v1054_v6  ;;  %v920_v9 = vld [vmem:[%s1176_s1] sm:$0xff]   ;;  %v923_v12 = vld [vmem:[%s1179_s4 + $0x8] sm:$0xff]   ;;  %v924_v13 = vld [vmem:[%s1179_s4 + $0x10] sm:$0xff]  }
   0x5   :  { %849 = vmatprep.mubr.msk.bf16.mxu1 %vm156_vm2, %v920_v9  ;;  %v922_v11 = vld [vmem:[%s1179_s4] sm:$0xff]   ;;  %v921_v14 = vld [vmem:[%s1176_s1 + $0x8] sm:$0xff]  }
   0x7   :  { %844 = vmatpush3.bf16.msra.mxu1 %v916_v3  ;;  %836 = vmatpush3.bf16.msra.mxu0 %v917_v4 }
   0x8   :  { %845 = vmatprep.subr.bf16.mxu1 %v918_v5  ;;  %853 = vmatprep.subr.bf16.mxu0 %v922_v11 }
   0xa   :  { %838 = vmatmul.mubr.msk.bf16.vlgmr.msra.gmra.mrb[0].mxu0 %vm54_vm1, %v37_v8 }
   0xb   :  { %846 = vmatpush3.bf16.msra.mxu1 %v918_v5  ;;  %854 = vmatpush3.bf16.msra.mxu0 %v922_v11 }
   0xc   :  { %847 = vmatprep.subr.bf16.mxu1 %v919_v10  ;;  %855 = vmatprep.subr.bf16.mxu0 %v923_v12 }
   0xd   :  { %861 = vmatprep.mubr.msk.bf16.mxu0 %vm156_vm2, %v920_v9 }
   0xf   :  { %848 = vmatpush3.bf16.msra.mxu1 %v919_v10 }
  0x10   :  { %13 = vsyncpa [#allocation7], 0  ;;  %856 = vmatpush3.bf16.msra.mxu0 %v923_v12  ;;  %865 = vmatprep.subr.bf16.mxu1 %v976_v1  ;;  %v925_v15 = vld [vmem:[%s1179_s4 + $0x18] sm:$0xff]   ;;  %vm103_vm3 = vcmask 7168   ;;  %v978_v40 = vmov -inf   ;;  %vm398_vm4 = vcmask 130048  }
  0x11   :  { %857 = vmatprep.subr.bf16.mxu0 %v924_v13  ;;  %104 = vst.msk [vmem:[#allocation3] sm:$0xff] %vm103_vm3, %v978_v40  ;;  %105 = vst.msk [vmem:[#allocation3 + $0x8] sm:$0xff] %vm103_vm3, %v978_v40  ;;  %v979_v51 = vmov 0  }
  0x12   :  { %850 = vmatmul.mubr.msk.bf16.vlgmr.msra.gmra.mrb[0].mxu1 %vm156_vm2, %v921_v14  ;;  %106 = vst.msk [vmem:[#allocation4] sm:$0xff] %vm103_vm3, %v976_v1  ;;  %107 = vst.msk [vmem:[#allocation4 + $0x8] sm:$0xff] %vm103_vm3, %v976_v1  ;;  %912 = vset.pattern.permute.xlu1 %v979_v51 }
  0x13   :  { %867 = vmatprep.mubr.msk.bf16.mxu1 %vm977_vm0, %v976_v1  ;;  %913 = vset.pattern.permute.xlu0 %v979_v51 }
  0x14   :  { %858 = vmatpush3.bf16.msra.mxu0 %v924_v13 }
  0x15   :  { %859 = vmatprep.subr.bf16.mxu0 %v925_v15 }
  0x18   :  { %860 = vmatpush3.bf16.msra.mxu0 %v925_v15  ;;  %v396_v52 = vld [vmem:[#allocation3] sm:$0xff]  ;;  %v397_v55 = vld [vmem:[#allocation3 + $0x8] sm:$0xff] }
  0x19   :  { %871 = vmatprep.subr.bf16.mxu0 %v976_v1  ;;  %v429_v15 = vld [vmem:[#allocation4] sm:$0xff] }
  0x1b   :  { %862 = vmatmul.mubr.msk.bf16.vlgmr.msra.gmra.mrb[4].mxu0 %vm156_vm2, %v921_v14 }
  0x1c   :  { %873 = vmatprep.mubr.msk.bf16.mxu0 %vm977_vm0, %v976_v1 }
  0xdd   :  { %v92_v16 = vpop.f32.mrb[0].mxu0 }
  0xde   :  { %v99_v17 = vmul.f32 0.17677669, %v92_v16  ;;  %v839_v18 = vpop.f32.mrb[1].mxu0 }
  0xdf   :  { %v95_v19 = vpop.f32.mrb[2].mxu0  ;;  %v430_v18 = vld [vmem:[#allocation4 + $0x8] sm:$0xff] }
  0xe0   :  { %v100_v20 = vmul.f32 0.17677669, %v95_v19  ;;  %v840_v21 = vpop.f32.mrb[3].mxu0 }
  0xe2   :  { %v101_v22 = vpack.c.bf16 %v100_v20, %v99_v17 }
  0xe4   :  { %102 = vst.msk [vmem:[#allocation2] sm:$0xff] %vm54_vm1, %v101_v22 }
  0xe5   :  { %v851_v23 = vpop.f32.mrb[0].mxu1 }
  0xe6   :  { %v197_v24 = vpop.f32.mrb[1].mxu1 }
  0xe7   :  { %v852_v25 = vpop.f32.mrb[2].mxu1 }
  0xe8   :  { %v294_v26 = vpack.c.bf16 %v852_v25, %v851_v23  ;;  %v200_v27 = vpop.f32.mrb[3].mxu1 }
  0xe9   :  { %v293_v28 = vpack.c.bf16 %v200_v27, %v197_v24 }
  0xea   :  { %v354_v29 = vsel %vm54_vm1, %v294_v26, 0  ;;  %v928_v26 = vld [vmem:[%s1180_s5] sm:$0xff]  }
  0xeb   :  { %v308_v30 = vsel %vm54_vm1, %v293_v28, 0  ;;  %872 = vmatpush3.bf16.xpose.msra.mxu0 %v354_v29  ;;  %v297_v31 = vld [vmem:[#allocation2] sm:$0xff]  ;;  %v929_v28 = vld [vmem:[%s1180_s5 + $0x8] sm:$0xff]  }
  0xec   :  { %866 = vmatpush3.bf16.xpose.msra.mxu1 %v308_v30  ;;  %883 = vmatprep.subr.bf16.mxu0 %v976_v1  ;;  %v793_v32 = vcombine.high %v297_v31, %v297_v31  ;;  %v792_v33 = vcombine.low %v297_v31, %v297_v31  ;;  %v444_v29 = vld [vmem:[#allocation5] sm:$0xff] }
  0xed   :  { %877 = vmatprep.subr.bf16.mxu1 %v976_v1 }
  0xee   :  { %v863_v34 = vpop.f32.mrb[4].mxu0 }
  0xef   :  { %v278_v35 = vpop.f32.mrb[5].mxu0 }
  0xf0   :  { %v864_v36 = vpop.f32.mrb[6].mxu0 }
  0xf1   :  { %v296_v37 = vpack.c.bf16 %v864_v36, %v863_v34  ;;  %v281_v38 = vpop.f32.mrb[7].mxu0 }
  0xf2   :  { %874 = vmatmul.mubr.msk.bf16.vlgmr.msra.gmra.mrb[8].mxu0 %vm54_vm1, %v793_v32  ;;  %v295_v39 = vpack.c.bf16 %v281_v38, %v278_v35  ;;  %v445_v32 = vld [vmem:[#allocation5 + $0x8] sm:$0xff] }
  0xf3   :  { %868 = vmatmul.mubr.msk.bf16.vlgmr.msra.gmra.mrb[4].mxu1 %vm54_vm1, %v792_v33  ;;  %885 = vmatprep.mubr.msk.bf16.mxu0 %vm977_vm0, %v976_v1 }
  0xf4   :  { %879 = vmatprep.mubr.msk.bf16.mxu1 %vm977_vm0, %v976_v1  ;;  %884 = vmatpush3.bf16.msra.mxu0 %v296_v37 }
  0xf5   :  { %878 = vmatpush3.bf16.msra.mxu1 %v295_v39  ;;  %897 = vmatprep.subr.bf16.mxu0 %v976_v1 }
  0xf6   :  { %889 = vmatprep.subr.bf16.mxu1 %v976_v1 }
 0x1c5   :  { %v390_v41 = vpop.f32.mrb[8].mxu0 }
 0x1c6   :  { %v344_v42 = vpop.f32.mrb[4].mxu1  ;;  %v875_v43 = vpop.f32.mrb[9].mxu0  ;;  %v402_v50 = vsel %vm398_vm4, %v390_v41, -inf }
 0x1c7   :  { %v869_v44 = vpop.f32.mrb[5].mxu1  ;;  %v393_v45 = vpop.f32.mrb[10].mxu0  ;;  %v399_v46 = vsel %vm398_vm4, %v344_v42, -inf }
 0x1c8   :  { %400 = vmax.xlane.f32.xlu0 %v399_v46  ;;  %v347_v47 = vpop.f32.mrb[6].mxu1  ;;  %v876_v48 = vpop.f32.mrb[11].mxu0 }
 0x1c9   :  { %v870_v49 = vpop.f32.mrb[7].mxu1 }
 0x1cc   :  { %403 = vmax.xlane.f32.xlu0 %v402_v50 }
 0x255   :  { %v401_v53 = vpop.xlane.xlu0 %400 }
 0x256   :  { %v405_v54 = vmax.f32 %v396_v52, %v401_v53  ;;  %v931_v53 = vld [vmem:[%s1181_s6 + $0x8] sm:$0xff]  }
 0x258   :  { %v407_v56 = vsub.f32 %v396_v52, %v405_v54  ;;  %550 = vst.msk [vmem:[#allocation3] sm:$0xff] %vm103_vm3, %v405_v54  ;;  %415 = vperm.xlu1 %912, %v405_v54   ;;  %v930_v52 = vld [vmem:[%s1181_s6] sm:$0xff]   ;;  %v579_v54 = vlaneseq  ;;  %s980_s6 = smov [#allocation6]  }
 0x259   :  { %v404_v57 = vpop.xlane.xlu0 %403 }
 0x25a   :  { %v406_v58 = vmax.f32 %v397_v55, %v404_v57  ;;  %v409_v12 = vmul.f32 1.442695, %v407_v56  ;;  %v573_v57 = vld [vmem:[%s1182_s7] sm:$0xf]  ;;  %s764_s7 = sshll.u32 %s980_s6, 4  ;;  %s765_s7 = int_to_ptr.vmem [resolvable:$true] %s764_s7 }
 0x25b   :  { %s952_s15 = scalar_lea.vmem %s765_s7, 256  ;;  %p957_p1 = scmp.lt.s32.totalorder %s765_s7, %s765_s7 }
 0x25c   :  { %v408_v59 = vsub.f32 %v397_v55, %v406_v58  ;;  %551 = vst.msk [vmem:[#allocation3 + $0x8] sm:$0xff] %vm103_vm3, %v406_v58  ;;  %420 = vperm.xlu1 %912, %v406_v58   ;;  %v1145_v55 = vshrl.u32 %v579_v54, 7  ;;  %p953_p0 = scmp.ne.s32.totalorder %s765_s7, %s952_s15  ;;  %p958_p2 = scmp.lt.s32.totalorder %s952_s15, %s952_s15 }
 0x25e   :  { %v411_v11 = vmul.f32 1.442695, %v408_v59  ;;  %v581_v56 = vsub.s32 0, %v1145_v55  ;;  %p959_p3 = por %p958_p2, %p957_p1 }
 0x260   :  { %v582_v58 = vrot.slane %v573_v57, %v581_v56  ;;  %p960_p4 = pnand %p959_p3, %p953_p0 }
 0x2d7   :  { %v416_v60 = vpop.permute.xlu1 %415 }
 0x2d8   :  { %v423_v61 = vsub.f32 %v344_v42, %v416_v60 }
 0x2da   :  { %v425_v62 = vmul.f32 1.442695, %v423_v61 }
 0x2db   :  { %v421_v63 = vpop.permute.xlu1 %420 }
 0x2dc   :  { %932 = vpow2.f32 %v425_v62  ;;  %v424_v0 = vsub.f32 %v390_v41, %v421_v63 }
 0x2de   :  { %v427_v2 = vmul.f32 1.442695, %v424_v0 }
 0x2e0   :  { %934 = vpow2.f32 %v427_v2 }
 0x2e1   :  { %936 = vpow2.f32 %v411_v11 }
 0x2e2   :  { %938 = vpow2.f32 %v409_v12 }
 0x2e6   :  { %v933_v3 = vpop.eup %932 }
 0x2e7   :  { %v433_v4 = vsel %vm398_vm4, %v933_v3, 0.0  ;;  %v458_v5 = vpack.c.bf16 %v933_v3, %v933_v3 }
 0x2e8   :  { %434 = vadd.xlane.f32.xlu0 %v433_v4 }
 0x2e9   :  { %880 = vmatmul.mubr.msk.bf16.vlgmr.msra.gmra.mrb[8].mxu1 %vm398_vm4, %v458_v5 }
 0x2ea   :  { %v935_v8 = vpop.eup %934  ;;  %893 = vmatprep.mubr.msk.bf16.mxu1 %vm977_vm0, %v976_v1  ;;  %890 = vmatpush3.bf16.msra.mxu1 %v928_v26 }
 0x2eb   :  { %v436_v9 = vsel %vm398_vm4, %v935_v8, 0.0  ;;  %v459_v10 = vpack.c.bf16 %v935_v8, %v935_v8  ;;  %v937_v13 = vpop.eup %936  ;;  %891 = vmatprep.subr.bf16.mxu1 %v976_v1 }
 0x2ec   :  { %437 = vadd.xlane.f32.xlu1 %v436_v9  ;;  %v939_v14 = vpop.eup %938  ;;  %v432_v20 = vmul.f32 %v937_v13, %v430_v18 }
 0x2ed   :  { %886 = vmatmul.mubr.msk.bf16.vlgmr.msra.gmra.mrb[12].mxu0 %vm398_vm4, %v459_v10  ;;  %v431_v16 = vmul.f32 %v939_v14, %v429_v15 }
 0x2ee   :  { %901 = vmatprep.mubr.msk.bf16.mxu0 %vm977_vm0, %v976_v1  ;;  %892 = vmatpush3.bf16.msra.mxu1 %v929_v28 }
 0x2ef   :  { %898 = vmatpush3.bf16.msra.mxu0 %v930_v52 }
 0x2f0   :  { %899 = vmatprep.subr.bf16.mxu0 %v976_v1 }
 0x2f3   :  { %900 = vmatpush3.bf16.msra.mxu0 %v931_v53 }
 0x2fd   :  { %453 = vperm.xlu1 %912, %v937_v13  }
 0x2fe   :  { %448 = vperm.xlu0 %913, %v939_v14   ;;  %v656_v14 = vsub.s32 1, %v1145_v55 }
 0x300   :  { %v657_v15 = vrot.slane %v573_v57, %v656_v14 }
 0x375   :  { %v435_v17 = vpop.xlane.xlu0 %434 }
 0x376   :  { %v439_v19 = vadd.f32 %v435_v17, %v431_v16 }
 0x378   :  { %442 = vst.msk [vmem:[#allocation4] sm:$0xff] %vm103_vm3, %v439_v19 }
 0x379   :  { %v438_v21 = vpop.xlane.xlu1 %437 }
 0x37a   :  { %v440_v22 = vadd.f32 %v438_v21, %v432_v20 }
 0x37c   :  { %443 = vst.msk [vmem:[#allocation4 + $0x8] sm:$0xff] %vm103_vm3, %v440_v22 }
 0x37d   :  { %v449_v30 = vpop.permute.xlu0 %448  ;;  %v454_v33 = vpop.permute.xlu1 %453 }
 0x37e   :  { %v456_v31 = vmul.f32 %v449_v30, %v444_v29  ;;  %v457_v38 = vmul.f32 %v454_v33, %v445_v32 }
 0x37f   :  { %v555_v23 = vld [vmem:[#allocation4] sm:$0xff] }
 0x380   :  { %940 = vrcp.f32 %v555_v23 }
 0x383   :  { %v556_v24 = vld [vmem:[#allocation4 + $0x8] sm:$0xff] }
 0x384   :  { %942 = vrcp.f32 %v556_v24 }
 0x38a   :  { %v941_v25 = vpop.eup %940 }
 0x38b   :  { %563 = vperm.xlu0 %913, %v941_v25  }
 0x38e   :  { %v943_v27 = vpop.eup %942 }
 0x38f   :  { %568 = vperm.xlu0 %913, %v943_v27  }
 0x3bc   :  { %v497_v34 = vpop.f32.mrb[8].mxu1 }
 0x3bd   :  { %v546_v35 = vadd.f32 %v497_v34, %v456_v31  ;;  %v881_v36 = vpop.f32.mrb[9].mxu1 }
 0x3be   :  { %v500_v37 = vpop.f32.mrb[10].mxu1 }
 0x3bf   :  { %548 = vst.msk [vmem:[#allocation5] sm:$0xff] %vm54_vm1, %v546_v35  ;;  %v882_v39 = vpop.f32.mrb[11].mxu1 }
 0x3c0   :  { %v540_v40 = vpop.f32.mrb[12].mxu0 }
 0x3c1   :  { %v547_v41 = vadd.f32 %v540_v40, %v457_v38  ;;  %v887_v42 = vpop.f32.mrb[13].mxu0  ;;  %v747_v40 = vsub.s32 2, %v1145_v55 }
 0x3c2   :  { %v543_v43 = vpop.f32.mrb[14].mxu0 }
 0x3c3   :  { %549 = vst.msk [vmem:[#allocation5 + $0x8] sm:$0xff] %vm54_vm1, %v547_v41  ;;  %v888_v44 = vpop.f32.mrb[15].mxu0  ;;  %v753_v41 = vsub.s32 3, %v1145_v55  ;;  %v748_v42 = vrot.slane %v573_v57, %v747_v40 }
 0x3c5   :  { %v754_v44 = vrot.slane %v573_v57, %v753_v41 }
 0x3c6   :  { %v559_v46 = vld [vmem:[#allocation5] sm:$0xff] }
 0x3ca   :  { %v560_v48 = vld [vmem:[#allocation5 + $0x8] sm:$0xff] }
 0x40a   :  { %v564_v45 = vpop.permute.xlu0 %563 }
 0x40b   :  { %v571_v49 = vmul.f32 %v564_v45, %v559_v46 }
 0x40e   :  { %v569_v47 = vpop.permute.xlu0 %568 }
 0x40f   :  { %v572_v50 = vmul.f32 %v569_v47, %v560_v48 }
 0x411   :  { %v574_v51 = vpack.c.bf16 %v572_v50, %v571_v49 }
 0x413   :  { %894 = vmatmul.mubr.msk.bf16.vlgmr.msra.gmra.mrb[12].mxu1 %vm54_vm1, %v574_v51 }
 0x4e6   :  { %v632_v59 = vpop.f32.mrb[12].mxu1 }
 0x4e7   :  { %v633_v60 = vadd.f32 %v632_v59, %v582_v58  ;;  %v895_v61 = vpop.f32.mrb[13].mxu1 }
 0x4e8   :  { %v635_v62 = vpop.f32.mrb[14].mxu1 }
 0x4e9   :  { %v641_v1 = vmul.f32 0.70710677, %v633_v60  ;;  %v636_v63 = vadd.f32 %v635_v62, %v582_v58  ;;  %v896_v0 = vpop.f32.mrb[15].mxu1  ;;  %v639_v8 = vmul.f32 0.5, %v633_v60 }
 0x4eb   :  { %944 = verf.f32 %v641_v1  ;;  %v642_v2 = vmul.f32 0.70710677, %v636_v63  ;;  %v640_v9 = vmul.f32 0.5, %v636_v63 }
 0x4ed   :  { %946 = verf.f32 %v642_v2 }
 0x4f5   :  { %v945_v3 = vpop.eup %944 }
 0x4f6   :  { %v645_v4 = vadd.f32 1.0, %v945_v3 }
 0x4f7   :  { %v947_v5 = vpop.eup %946 }
 0x4f8   :  { %v646_v10 = vadd.f32 1.0, %v947_v5  ;;  %v647_v11 = vmul.f32 %v645_v4, %v639_v8 }
 0x4fa   :  { %v648_v12 = vmul.f32 %v646_v10, %v640_v9 }
 0x4fc   :  { %v649_v13 = vpack.c.bf16 %v648_v12, %v647_v11 }
 0x4fe   :  { %902 = vmatmul.mubr.msk.bf16.vlgmr.msra.gmra.mrb[16].mxu0 %vm54_vm1, %v649_v13 }
 0x5d1   :  { %v707_v16 = vpop.f32.mrb[16].mxu0 }
 0x5d2   :  { %v708_v17 = vadd.f32 %v707_v16, %v657_v15  ;;  %v903_v18 = vpop.f32.mrb[17].mxu0 }
 0x5d3   :  { %v710_v19 = vpop.f32.mrb[18].mxu0 }
 0x5d4   :  { %v711_v20 = vadd.f32 %v710_v19, %v657_v15  ;;  %v904_v21 = vpop.f32.mrb[19].mxu0  ;;  %v716_v22 = vadd.f32 %v708_v17, %v1054_v6 }
 0x5d6   :  { %v718_v23 = vsel %vm54_vm1, %v716_v22, 0.0  ;;  %v717_v24 = vadd.f32 %v711_v20, %v1059_v7 }
 0x5d7   :  { %719 = vadd.xlane.f32.xlu1 %v718_v23 }
 0x5d8   :  { %v721_v25 = vsel %vm54_vm1, %v717_v24, 0.0 }
 0x5d9   :  { %722 = vadd.xlane.f32.xlu0 %v721_v25 }
 0x664   :  { %v720_v26 = vpop.xlane.xlu1 %719 }
 0x665   :  { %v725_v27 = vmul.f32 0.03125, %v720_v26 }
 0x666   :  { %v723_v28 = vpop.xlane.xlu0 %722 }
 0x667   :  { %v727_v29 = vsub.f32 %v716_v22, %v725_v27  ;;  %v726_v30 = vmul.f32 0.03125, %v723_v28 }
 0x669   :  { %v728_v31 = vsub.f32 %v717_v24, %v726_v30  ;;  %v729_v32 = vmul.f32 %v727_v29, %v727_v29 }
 0x66b   :  { %v731_v33 = vsel %vm54_vm1, %v729_v32, 0.0  ;;  %v730_v34 = vmul.f32 %v728_v31, %v728_v31 }
 0x66c   :  { %732 = vadd.xlane.f32.xlu0 %v731_v33 }
 0x66d   :  { %v734_v6 = vsel %vm54_vm1, %v730_v34, 0.0 }
 0x66e   :  { %735 = vadd.xlane.f32.xlu1 %v734_v6 }
 0x6f9   :  { %v733_v35 = vpop.xlane.xlu0 %732 }
 0x6fa   :  { %v737_v7 = vmul.f32 0.03125, %v733_v35 }
 0x6fb   :  { %v736_v36 = vpop.xlane.xlu1 %735 }
 0x6fc   :  { %v739_v37 = vadd.f32 1e-05, %v737_v7  ;;  %v738_v38 = vmul.f32 0.03125, %v736_v36 }
 0x6fe   :  { %948 = vrsqrt.f32 %v739_v37  ;;  %v740_v39 = vadd.f32 1e-05, %v738_v38 }
 0x700   :  { %950 = vrsqrt.f32 %v740_v39 }
 0x708   :  { %v949_v43 = vpop.eup %948 }
 0x709   :  { %v743_v45 = vmul.f32 %v949_v43, %v727_v29 }
 0x70a   :  { %v951_v46 = vpop.eup %950 }
 0x70b   :  { %v744_v47 = vmul.f32 %v951_v46, %v728_v31  ;;  %v749_v48 = vmul.f32 %v748_v42, %v743_v45 }
 0x70d   :  { %v750_v49 = vmul.f32 %v748_v42, %v744_v47  ;;  %v755_v50 = vadd.f32 %v754_v44, %v749_v48 }
 0x70f   :  { %v756_v51 = vadd.f32 %v754_v44, %v750_v49  ;;  %757 = vst.msk [vmem:[#allocation6] sm:$0xff] %vm54_vm1, %v755_v50 }
 0x711   :  { %758 = vst.msk [vmem:[#allocation6 + $0x8] sm:$0xff] %vm54_vm1, %v756_v51 }
 0x712   :  { %963 = shalt.err (!%p960_p4)
}
 0x713   :  { %s964_s2 = scalar_lea.hbm %s1183_s8, 256 }
 0x714   :  { %p965_p5 = scmp.ne.s32.totalorder %s1183_s8, %s964_s2  ;;  %p968_p6 = scmp.lt.u32.totalorder %s964_s2, %s1183_s8 }
 0x716   :  { %p970_p7 = pnand %p968_p6, %p965_p5 }
 0x718   :  { %973 = shalt.err (!%p970_p7)
}
 0x719   :  { %s981_s22 = smov 128   ;;  %s982_s0 = smov 8  }
 0x71a   :  { %770 = dma.vmem_to_hbm [thread:$0]  %s765_s7, 256, %s1183_s8, [#allocation7], %s981_s22, %s981_s22, %s982_s0  }
 0x71b   :  { %974 = dma.done.wait [#allocation7], 256  }
 0x71c   :  { %975 = vsyncadd [#allocation7], 4294967040 }
 0x71d   :  { %774 = vsyncpa [#allocation7], 1 }

// kernel: tpu_custom_call.1
= control target key start
LH: loop header
LB: loop body
LE: loop exit
PB: predicated region body
PF: predicated region fallthrough
CT: control target
= control target key end

     0   :  { %v976_v1 = vmov 0.0   ;;  %vm977_vm0 = vmmov 0   ;;  %vm54_vm1 = vcmask 261120   ;;  %vm156_vm2 = vcmask 523264   ;;  %s1175_s0 = inlined_call_operand.vmem [shape: f32[2,8,32], index: 0, kind: input, shape index: {}]   ;;  %s1176_s1 = inlined_call_operand.vmem [shape: bf16[2,16,64], index: 1, kind: input, shape index: {}]   ;;  %s1177_s2 = inlined_call_operand.vmem [shape: bf16[32,32], index: 2, kind: input, shape index: {}]   ;;  %s1178_s3 = inlined_call_operand.vmem [shape: bf16[64,32], index: 3, kind: input, shape index: {}]   ;;  %s1179_s4 = inlined_call_operand.vmem [shape: bf16[64,32], index: 4, kind: input, shape index: {}]   ;;  %s1180_s5 = inlined_call_operand.vmem [shape: bf16[32,32], index: 5, kind: input, shape index: {}]   ;;  %s1181_s6 = inlined_call_operand.vmem [shape: bf16[32,32], index: 6, kind: input, shape index: {}]   ;;  %s1182_s7 = inlined_call_operand.vmem [shape: f32[4,32], index: 7, kind: input, shape index: {}]   ;;  %s1183_s8 = inlined_call_operand.hbm [shape: f32[2,8,32], index: 8, kind: output, shape index: {}]  }
   0x1   :  { %v914_v0 = vld [vmem:[%s1178_s3] sm:$0xff]   ;;  %833 = vmatprep.subr.bf16.mxu0 %v976_v1  ;;  %v916_v3 = vld [vmem:[%s1178_s3 + $0x8] sm:$0xff]   ;;  %837 = vmatprep.mubr.msk.bf16.mxu0 %vm977_vm0, %v976_v1  ;;  %108 = vst.msk [vmem:[#allocation5] sm:$0xff] %vm54_vm1, %v976_v1  ;;  %109 = vst.msk [vmem:[#allocation5 + $0x8] sm:$0xff] %vm54_vm1, %v976_v1 }
   0x2   :  { %v915_v2 = vld [vmem:[%s1177_s2] sm:$0xff]   ;;  %841 = vmatprep.subr.bf16.mxu1 %v914_v0  ;;  %v917_v4 = vld [vmem:[%s1177_s2 + $0x8] sm:$0xff]   ;;  %v918_v5 = vld [vmem:[%s1178_s3 + $0x10] sm:$0xff]  }
   0x3   :  { %842 = vmatpush3.bf16.msra.mxu1 %v914_v0  ;;  %834 = vmatpush3.bf16.msra.mxu0 %v915_v2  ;;  %v1054_v6 = vld [vmem:[%s1175_s0] sm:$0xff]  ;;  %v1059_v7 = vld [vmem:[%s1175_s0 + $0x8] sm:$0xff]  ;;  %v919_v10 = vld [vmem:[%s1178_s3 + $0x18] sm:$0xff]  }
   0x4   :  { %843 = vmatprep.subr.bf16.mxu1 %v916_v3  ;;  %835 = vmatprep.subr.bf16.mxu0 %v976_v1  ;;  %v37_v8 = vpack.c.bf16 %v1059_v7, %v1054_v6  ;;  %v920_v9 = vld [vmem:[%s1176_s1] sm:$0xff]   ;;  %v923_v12 = vld [vmem:[%s1179_s4 + $0x8] sm:$0xff]   ;;  %v924_v13 = vld [vmem:[%s1179_s4 + $0x10] sm:$0xff]  }
   0x5   :  { %849 = vmatprep.mubr.msk.bf16.mxu1 %vm156_vm2, %v920_v9  ;;  %v922_v11 = vld [vmem:[%s1179_s4] sm:$0xff]   ;;  %v921_v14 = vld [vmem:[%s1176_s1 + $0x8] sm:$0xff]  }
   0x7   :  { %844 = vmatpush3.bf16.msra.mxu1 %v916_v3  ;;  %836 = vmatpush3.bf16.msra.mxu0 %v917_v4 }
   0x8   :  { %845 = vmatprep.subr.bf16.mxu1 %v918_v5  ;;  %853 = vmatprep.subr.bf16.mxu0 %v922_v11 }
   0xa   :  { %838 = vmatmul.mubr.msk.bf16.vlgmr.msra.gmra.mrb[0].mxu0 %vm54_vm1, %v37_v8 }
   0xb   :  { %846 = vmatpush3.bf16.msra.mxu1 %v918_v5  ;;  %854 = vmatpush3.bf16.msra.mxu0 %v922_v11 }
   0xc   :  { %847 = vmatprep.subr.bf16.mxu1 %v919_v10  ;;  %855 = vmatprep.subr.bf16.mxu0 %v923_v12 }
   0xd   :  { %861 = vmatprep.mubr.msk.bf16.mxu0 %vm156_vm2, %v920_v9 }
   0xf   :  { %848 = vmatpush3.bf16.msra.mxu1 %v919_v10 }
  0x10   :  { %13 = vsyncpa [#allocation7], 0  ;;  %856 = vmatpush3.bf16.msra.mxu0 %v923_v12  ;;  %865 = vmatprep.subr.bf16.mxu1 %v976_v1  ;;  %v925_v15 = vld [vmem:[%s1179_s4 + $0x18] sm:$0xff]   ;;  %vm103_vm3 = vcmask 7168   ;;  %v978_v40 = vmov -inf   ;;  %vm398_vm4 = vcmask 130048  }
  0x11   :  { %857 = vmatprep.subr.bf16.mxu0 %v924_v13  ;;  %104 = vst.msk [vmem:[#allocation3] sm:$0xff] %vm103_vm3, %v978_v40  ;;  %105 = vst.msk [vmem:[#allocation3 + $0x8] sm:$0xff] %vm103_vm3, %v978_v40  ;;  %v979_v51 = vmov 0  }
  0x12   :  { %850 = vmatmul.mubr.msk.bf16.vlgmr.msra.gmra.mrb[0].mxu1 %vm156_vm2, %v921_v14  ;;  %106 = vst.msk [vmem:[#allocation4] sm:$0xff] %vm103_vm3, %v976_v1  ;;  %107 = vst.msk [vmem:[#allocation4 + $0x8] sm:$0xff] %vm103_vm3, %v976_v1  ;;  %912 = vset.pattern.permute.xlu1 %v979_v51 }
  0x13   :  { %867 = vmatprep.mubr.msk.bf16.mxu1 %vm977_vm0, %v976_v1  ;;  %913 = vset.pattern.permute.xlu0 %v979_v51 }
  0x14   :  { %858 = vmatpush3.bf16.msra.mxu0 %v924_v13 }
  0x15   :  { %859 = vmatprep.subr.bf16.mxu0 %v925_v15 }
  0x18   :  { %860 = vmatpush3.bf16.msra.mxu0 %v925_v15  ;;  %v396_v52 = vld [vmem:[#allocation3] sm:$0xff]  ;;  %v397_v55 = vld [vmem:[#allocation3 + $0x8] sm:$0xff] }
  0x19   :  { %871 = vmatprep.subr.bf16.mxu0 %v976_v1  ;;  %v429_v15 = vld [vmem:[#allocation4] sm:$0xff] }
  0x1b   :  { %862 = vmatmul.mubr.msk.bf16.vlgmr.msra.gmra.mrb[4].mxu0 %vm156_vm2, %v921_v14 }
  0x1c   :  { %873 = vmatprep.mubr.msk.bf16.mxu0 %vm977_vm0, %v976_v1 }
  0xdd   :  { %v92_v16 = vpop.f32.mrb[0].mxu0 }
  0xde   :  { %v99_v17 = vmul.f32 0.17677669, %v92_v16  ;;  %v839_v18 = vpop.f32.mrb[1].mxu0 }
  0xdf   :  { %v95_v19 = vpop.f32.mrb[2].mxu0  ;;  %v430_v18 = vld [vmem:[#allocation4 + $0x8] sm:$0xff] }
  0xe0   :  { %v100_v20 = vmul.f32 0.17677669, %v95_v19  ;;  %v840_v21 = vpop.f32.mrb[3].mxu0 }
  0xe2   :  { %v101_v22 = vpack.c.bf16 %v100_v20, %v99_v17 }
  0xe4   :  { %102 = vst.msk [vmem:[#allocation2] sm:$0xff] %vm54_vm1, %v101_v22 }
  0xe5   :  { %v851_v23 = vpop.f32.mrb[0].mxu1 }
  0xe6   :  { %v197_v24 = vpop.f32.mrb[1].mxu1 }
  0xe7   :  { %v852_v25 = vpop.f32.mrb[2].mxu1 }
  0xe8   :  { %v294_v26 = vpack.c.bf16 %v852_v25, %v851_v23  ;;  %v200_v27 = vpop.f32.mrb[3].mxu1 }
  0xe9   :  { %v293_v28 = vpack.c.bf16 %v200_v27, %v197_v24 }
  0xea   :  { %v354_v29 = vsel %vm54_vm1, %v294_v26, 0  ;;  %v928_v26 = vld [vmem:[%s1180_s5] sm:$0xff]  }
  0xeb   :  { %v308_v30 = vsel %vm54_vm1, %v293_v28, 0  ;;  %872 = vmatpush3.bf16.xpose.msra.mxu0 %v354_v29  ;;  %v297_v31 = vld [vmem:[#allocation2] sm:$0xff]  ;;  %v929_v28 = vld [vmem:[%s1180_s5 + $0x8] sm:$0xff]  }
  0xec   :  { %866 = vmatpush3.bf16.xpose.msra.mxu1 %v308_v30  ;;  %883 = vmatprep.subr.bf16.mxu0 %v976_v1  ;;  %v793_v32 = vcombine.high %v297_v31, %v297_v31  ;;  %v792_v33 = vcombine.low %v297_v31, %v297_v31  ;;  %v444_v29 = vld [vmem:[#allocation5] sm:$0xff] }
  0xed   :  { %877 = vmatprep.subr.bf16.mxu1 %v976_v1 }
  0xee   :  { %v863_v34 = vpop.f32.mrb[4].mxu0 }
  0xef   :  { %v278_v35 = vpop.f32.mrb[5].mxu0 }
  0xf0   :  { %v864_v36 = vpop.f32.mrb[6].mxu0 }
  0xf1   :  { %v296_v37 = vpack.c.bf16 %v864_v36, %v863_v34  ;;  %v281_v38 = vpop.f32.mrb[7].mxu0 }
  0xf2   :  { %874 = vmatmul.mubr.msk.bf16.vlgmr.msra.gmra.mrb[8].mxu0 %vm54_vm1, %v793_v32  ;;  %v295_v39 = vpack.c.bf16 %v281_v38, %v278_v35  ;;  %v445_v32 = vld [vmem:[#allocation5 + $0x8] sm:$0xff] }
  0xf3   :  { %868 = vmatmul.mubr.msk.bf16.vlgmr.msra.gmra.mrb[4].mxu1 %vm54_vm1, %v792_v33  ;;  %885 = vmatprep.mubr.msk.bf16.mxu0 %vm977_vm0, %v976_v1 }
  0xf4   :  { %879 = vmatprep.mubr.msk.bf16.mxu1 %vm977_vm0, %v976_v1  ;;  %884 = vmatpush3.bf16.msra.mxu0 %v296_v37 }
  0xf5   :  { %878 = vmatpush3.bf16.msra.mxu1 %v295_v39  ;;  %897 = vmatprep.subr.bf16.mxu0 %v976_v1 }
  0xf6   :  { %889 = vmatprep.subr.bf16.mxu1 %v976_v1 }
 0x1c5   :  { %v390_v41 = vpop.f32.mrb[8].mxu0 }
 0x1c6   :  { %v344_v42 = vpop.f32.mrb[4].mxu1  ;;  %v875_v43 = vpop.f32.mrb[9].mxu0  ;;  %v402_v50 = vsel %vm398_vm4, %v390_v41, -inf }
 0x1c7   :  { %v869_v44 = vpop.f32.mrb[5].mxu1  ;;  %v393_v45 = vpop.f32.mrb[10].mxu0  ;;  %v399_v46 = vsel %vm398_vm4, %v344_v42, -inf }
 0x1c8   :  { %400 = vmax.xlane.f32.xlu0 %v399_v46  ;;  %v347_v47 = vpop.f32.mrb[6].mxu1  ;;  %v876_v48 = vpop.f32.mrb[11].mxu0 }
 0x1c9   :  { %v870_v49 = vpop.f32.mrb[7].mxu1 }
 0x1cc   :  { %403 = vmax.xlane.f32.xlu0 %v402_v50 }
 0x255   :  { %v401_v53 = vpop.xlane.xlu0 %400 }
 0x256   :  { %v405_v54 = vmax.f32 %v396_v52, %v401_v53  ;;  %v931_v53 = vld [vmem:[%s1181_s6 + $0x8] sm:$0xff]  }
 0x258   :  { %v407_v56 = vsub.f32 %v396_v52, %v405_v54  ;;  %550 = vst.msk [vmem:[#allocation3] sm:$0xff] %vm103_vm3, %v405_v54  ;;  %415 = vperm.xlu1 %912, %v405_v54   ;;  %v930_v52 = vld [vmem:[%s1181_s6] sm:$0xff]   ;;  %v579_v54 = vlaneseq  ;;  %s980_s6 = smov [#allocation6]  }
 0x259   :  { %v404_v57 = vpop.xlane.xlu0 %403 }
 0x25a   :  { %v406_v58 = vmax.f32 %v397_v55, %v404_v57  ;;  %v409_v12 = vmul.f32 1.442695, %v407_v56  ;;  %v573_v57 = vld [vmem:[%s1182_s7] sm:$0xf]  ;;  %s764_s7 = sshll.u32 %s980_s6, 4  ;;  %s765_s7 = int_to_ptr.vmem [resolvable:$true] %s764_s7 }
 0x25b   :  { %s952_s15 = scalar_lea.vmem %s765_s7, 256  ;;  %p957_p1 = scmp.lt.s32.totalorder %s765_s7, %s765_s7 }
 0x25c   :  { %v408_v59 = vsub.f32 %v397_v55, %v406_v58  ;;  %551 = vst.msk [vmem:[#allocation3 + $0x8] sm:$0xff] %vm103_vm3, %v406_v58  ;;  %420 = vperm.xlu1 %912, %v406_v58   ;;  %v1145_v55 = vshrl.u32 %v579_v54, 7  ;;  %p953_p0 = scmp.ne.s32.totalorder %s765_s7, %s952_s15  ;;  %p958_p2 = scmp.lt.s32.totalorder %s952_s15, %s952_s15 }
 0x25e   :  { %v411_v11 = vmul.f32 1.442695, %v408_v59  ;;  %v581_v56 = vsub.s32 0, %v1145_v55  ;;  %p959_p3 = por %p958_p2, %p957_p1 }
 0x260   :  { %v582_v58 = vrot.slane %v573_v57, %v581_v56  ;;  %p960_p4 = pnand %p959_p3, %p953_p0 }
 0x2d7   :  { %v416_v60 = vpop.permute.xlu1 %415 }
 0x2d8   :  { %v423_v61 = vsub.f32 %v344_v42, %v416_v60 }
 0x2da   :  { %v425_v62 = vmul.f32 1.442695, %v423_v61 }
 0x2db   :  { %v421_v63 = vpop.permute.xlu1 %420 }
 0x2dc   :  { %932 = vpow2.f32 %v425_v62  ;;  %v424_v0 = vsub.f32 %v390_v41, %v421_v63 }
 0x2de   :  { %v427_v2 = vmul.f32 1.442695, %v424_v0 }
 0x2e0   :  { %934 = vpow2.f32 %v427_v2 }
 0x2e1   :  { %936 = vpow2.f32 %v411_v11 }
 0x2e2   :  { %938 = vpow2.f32 %v409_v12 }
 0x2e6   :  { %v933_v3 = vpop.eup %932 }
 0x2e7   :  { %v433_v4 = vsel %vm398_vm4, %v933_v3, 0.0  ;;  %v458_v5 = vpack.c.bf16 %v933_v3, %v933_v3 }
 0x2e8   :  { %434 = vadd.xlane.f32.xlu0 %v433_v4 }
 0x2e9   :  { %880 = vmatmul.mubr.msk.bf16.vlgmr.msra.gmra.mrb[8].mxu1 %vm398_vm4, %v458_v5 }
 0x2ea   :  { %v935_v8 = vpop.eup %934  ;;  %893 = vmatprep.mubr.msk.bf16.mxu1 %vm977_vm0, %v976_v1  ;;  %890 = vmatpush3.bf16.msra.mxu1 %v928_v26 }
 0x2eb   :  { %v436_v9 = vsel %vm398_vm4, %v935_v8, 0.0  ;;  %v459_v10 = vpack.c.bf16 %v935_v8, %v935_v8  ;;  %v937_v13 = vpop.eup %936  ;;  %891 = vmatprep.subr.bf16.mxu1 %v976_v1 }
 0x2ec   :  { %437 = vadd.xlane.f32.xlu1 %v436_v9  ;;  %v939_v14 = vpop.eup %938  ;;  %v432_v20 = vmul.f32 %v937_v13, %v430_v18 }
 0x2ed   :  { %886 = vmatmul.mubr.msk.bf16.vlgmr.msra.gmra.mrb[12].mxu0 %vm398_vm4, %v459_v10  ;;  %v431_v16 = vmul.f32 %v939_v14, %v429_v15 }
 0x2ee   :  { %901 = vmatprep.mubr.msk.bf16.mxu0 %vm977_vm0, %v976_v1  ;;  %892 = vmatpush3.bf16.msra.mxu1 %v929_v28 }
 0x2ef   :  { %898 = vmatpush3.bf16.msra.mxu0 %v930_v52 }
 0x2f0   :  { %899 = vmatprep.subr.bf16.mxu0 %v976_v1 }
 0x2f3   :  { %900 = vmatpush3.bf16.msra.mxu0 %v931_v53 }
 0x2fd   :  { %453 = vperm.xlu1 %912, %v937_v13  }
 0x2fe   :  { %448 = vperm.xlu0 %913, %v939_v14   ;;  %v656_v14 = vsub.s32 1, %v1145_v55 }
 0x300   :  { %v657_v15 = vrot.slane %v573_v57, %v656_v14 }
 0x375   :  { %v435_v17 = vpop.xlane.xlu0 %434 }
 0x376   :  { %v439_v19 = vadd.f32 %v435_v17, %v431_v16 }
 0x378   :  { %442 = vst.msk [vmem:[#allocation4] sm:$0xff] %vm103_vm3, %v439_v19 }
 0x379   :  { %v438_v21 = vpop.xlane.xlu1 %437 }
 0x37a   :  { %v440_v22 = vadd.f32 %v438_v21, %v432_v20 }
 0x37c   :  { %443 = vst.msk [vmem:[#allocation4 + $0x8] sm:$0xff] %vm103_vm3, %v440_v22 }
 0x37d   :  { %v449_v30 = vpop.permute.xlu0 %448  ;;  %v454_v33 = vpop.permute.xlu1 %453 }
 0x37e   :  { %v456_v31 = vmul.f32 %v449_v30, %v444_v29  ;;  %v457_v38 = vmul.f32 %v454_v33, %v445_v32 }
 0x37f   :  { %v555_v23 = vld [vmem:[#allocation4] sm:$0xff] }
 0x380   :  { %940 = vrcp.f32 %v555_v23 }
 0x383   :  { %v556_v24 = vld [vmem:[#allocation4 + $0x8] sm:$0xff] }
 0x384   :  { %942 = vrcp.f32 %v556_v24 }
 0x38a   :  { %v941_v25 = vpop.eup %940 }
 0x38b   :  { %563 = vperm.xlu0 %913, %v941_v25  }
 0x38e   :  { %v943_v27 = vpop.eup %942 }
 0x38f   :  { %568 = vperm.xlu0 %913, %v943_v27  }
 0x3bc   :  { %v497_v34 = vpop.f32.mrb[8].mxu1 }
 0x3bd   :  { %v546_v35 = vadd.f32 %v497_v34, %v456_v31  ;;  %v881_v36 = vpop.f32.mrb[9].mxu1 }
 0x3be   :  { %v500_v37 = vpop.f32.mrb[10].mxu1 }
 0x3bf   :  { %548 = vst.msk [vmem:[#allocation5] sm:$0xff] %vm54_vm1, %v546_v35  ;;  %v882_v39 = vpop.f32.mrb[11].mxu1 }
 0x3c0   :  { %v540_v40 = vpop.f32.mrb[12].mxu0 }
 0x3c1   :  { %v547_v41 = vadd.f32 %v540_v40, %v457_v38  ;;  %v887_v42 = vpop.f32.mrb[13].mxu0  ;;  %v747_v40 = vsub.s32 2, %v1145_v55 }
 0x3c2   :  { %v543_v43 = vpop.f32.mrb[14].mxu0 }
 0x3c3   :  { %549 = vst.msk [vmem:[#allocation5 + $0x8] sm:$0xff] %vm54_vm1, %v547_v41  ;;  %v888_v44 = vpop.f32.mrb[15].mxu0  ;;  %v753_v41 = vsub.s32 3, %v1145_v55  ;;  %v748_v42 = vrot.slane %v573_v57, %v747_v40 }
 0x3c5   :  { %v754_v44 = vrot.slane %v573_v57, %v753_v41 }
 0x3c6   :  { %v559_v46 = vld [vmem:[#allocation5] sm:$0xff] }
 0x3ca   :  { %v560_v48 = vld [vmem:[#allocation5 + $0x8] sm:$0xff] }
 0x40a   :  { %v564_v45 = vpop.permute.xlu0 %563 }
 0x40b   :  { %v571_v49 = vmul.f32 %v564_v45, %v559_v46 }
 0x40e   :  { %v569_v47 = vpop.permute.xlu0 %568 }
 0x40f   :  { %v572_v50 = vmul.f32 %v569_v47, %v560_v48 }
 0x411   :  { %v574_v51 = vpack.c.bf16 %v572_v50, %v571_v49 }
 0x413   :  { %894 = vmatmul.mubr.msk.bf16.vlgmr.msra.gmra.mrb[12].mxu1 %vm54_vm1, %v574_v51 }
 0x4e6   :  { %v632_v59 = vpop.f32.mrb[12].mxu1 }
 0x4e7   :  { %v633_v60 = vadd.f32 %v632_v59, %v582_v58  ;;  %v895_v61 = vpop.f32.mrb[13].mxu1 }
 0x4e8   :  { %v635_v62 = vpop.f32.mrb[14].mxu1 }
 0x4e9   :  { %v641_v1 = vmul.f32 0.70710677, %v633_v60  ;;  %v636_v63 = vadd.f32 %v635_v62, %v582_v58  ;;  %v896_v0 = vpop.f32.mrb[15].mxu1  ;;  %v639_v8 = vmul.f32 0.5, %v633_v60 }
 0x4eb   :  { %944 = verf.f32 %v641_v1  ;;  %v642_v2 = vmul.f32 0.70710677, %v636_v63  ;;  %v640_v9 = vmul.f32 0.5, %v636_v63 }
 0x4ed   :  { %946 = verf.f32 %v642_v2 }
 0x4f5   :  { %v945_v3 = vpop.eup %944 }
 0x4f6   :  { %v645_v4 = vadd.f32 1.0, %v945_v3 }
 0x4f7   :  { %v947_v5 = vpop.eup %946 }
 0x4f8   :  { %v646_v10 = vadd.f32 1.0, %v947_v5  ;;  %v647_v11 = vmul.f32 %v645_v4, %v639_v8 }
 0x4fa   :  { %v648_v12 = vmul.f32 %v646_v10, %v640_v9 }
 0x4fc   :  { %v649_v13 = vpack.c.bf16 %v648_v12, %v647_v11 }
 0x4fe   :  { %902 = vmatmul.mubr.msk.bf16.vlgmr.msra.gmra.mrb[16].mxu0 %vm54_vm1, %v649_v13 }
 0x5d1   :  { %v707_v16 = vpop.f32.mrb[16].mxu0 }
 0x5d2   :  { %v708_v17 = vadd.f32 %v707_v16, %v657_v15  ;;  %v903_v18 = vpop.f32.mrb[17].mxu0 }
 0x5d3   :  { %v710_v19 = vpop.f32.mrb[18].mxu0 }
 0x5d4   :  { %v711_v20 = vadd.f32 %v710_v19, %v657_v15  ;;  %v904_v21 = vpop.f32.mrb[19].mxu0  ;;  %v716_v22 = vadd.f32 %v708_v17, %v1054_v6 }
 0x5d6   :  { %v718_v23 = vsel %vm54_vm1, %v716_v22, 0.0  ;;  %v717_v24 = vadd.f32 %v711_v20, %v1059_v7 }
 0x5d7   :  { %719 = vadd.xlane.f32.xlu1 %v718_v23 }
 0x5d8   :  { %v721_v25 = vsel %vm54_vm1, %v717_v24, 0.0 }
 0x5d9   :  { %722 = vadd.xlane.f32.xlu0 %v721_v25 }
 0x664   :  { %v720_v26 = vpop.xlane.xlu1 %719 }
 0x665   :  { %v725_v27 = vmul.f32 0.03125, %v720_v26 }
 0x666   :  { %v723_v28 = vpop.xlane.xlu0 %722 }
 0x667   :  { %v727_v29 = vsub.f32 %v716_v22, %v725_v27  ;;  %v726_v30 = vmul.f32 0.03125, %v723_v28 }
 0x669   :  { %v728_v31 = vsub.f32 %v717_v24, %v726_v30  ;;  %v729_v32 = vmul.f32 %v727_v29, %v727_v29 }
 0x66b   :  { %v731_v33 = vsel %vm54_vm1, %v729_v32, 0.0  ;;  %v730_v34 = vmul.f32 %v728_v31, %v728_v31 }
 0x66c   :  { %732 = vadd.xlane.f32.xlu0 %v731_v33 }
 0x66d   :  { %v734_v6 = vsel %vm54_vm1, %v730_v34, 0.0 }
 0x66e   :  { %735 = vadd.xlane.f32.xlu1 %v734_v6 }
 0x6f9   :  { %v733_v35 = vpop.xlane.xlu0 %732 }
 0x6fa   :  { %v737_v7 = vmul.f32 0.03125, %v733_v35 }
 0x6fb   :  { %v736_v36 = vpop.xlane.xlu1 %735 }
 0x6fc   :  { %v739_v37 = vadd.f32 1e-05, %v737_v7  ;;  %v738_v38 = vmul.f32 0.03125, %v736_v36 }
 0x6fe   :  { %948 = vrsqrt.f32 %v739_v37  ;;  %v740_v39 = vadd.f32 1e-05, %v738_v38 }
 0x700   :  { %950 = vrsqrt.f32 %v740_v39 }
 0x708   :  { %v949_v43 = vpop.eup %948 }
 0x709   :  { %v743_v45 = vmul.f32 %v949_v43, %v727_v29 }
 0x70a   :  { %v951_v46 = vpop.eup %950 }
 0x70b   :  { %v744_v47 = vmul.f32 %v951_v46, %v728_v31  ;;  %v749_v48 = vmul.f32 %v748_v42, %v743_v45 }
 0x70d   :  { %v750_v49 = vmul.f32 %v748_v42, %v744_v47  ;;  %v755_v50 = vadd.f32 %v754_v44, %v749_v48 }
 0x70f   :  { %v756_v51 = vadd.f32 %v754_v44, %v750_v49  ;;  %757 = vst.msk [vmem:[#allocation6] sm:$0xff] %vm54_vm1, %v755_v50 }
 0x711   :  { %758 = vst.msk [vmem:[#allocation6 + $0x8] sm:$0xff] %vm54_vm1, %v756_v51 }
 0x712   :  { %963 = shalt.err (!%p960_p4)
}
 0x713   :  { %s964_s2 = scalar_lea.hbm %s1183_s8, 256 }
 0x714   :  { %p965_p5 = scmp.ne.s32.totalorder %s1183_s8, %s964_s2  ;;  %p968_p6 = scmp.lt.u32.totalorder %s964_s2, %s1183_s8 }
 0x716   :  { %p970_p7 = pnand %p968_p6, %p965_p5 }
 0x718   :  { %973 = shalt.err (!%p970_p7)
}
 0x719   :  { %s981_s22 = smov 128   ;;  %s982_s0 = smov 8  }
 0x71a   :  { %770 = dma.vmem_to_hbm [thread:$0]  %s765_s7, 256, %s1183_s8, [#allocation7], %s981_s22, %s981_s22, %s982_s0  }
 0x71b   :  { %974 = dma.done.wait [#allocation7], 256  }
 0x71c   :  { %975 = vsyncadd [#allocation7], 4294967040 }
 0x71d   :  { %774 = vsyncpa [#allocation7], 1 }

</bundles_post_ra>
